<compile_context>
chip_gen: v5e
topology: v5e:2x2
jax: 0.10.0
libtpu: 0.0.40
codegen_flags: <defaults>
</compile_context>

<pallas_src>
import jax
import jax.numpy as jnp
from jax.experimental import pallas as pl
from jax.experimental.pallas import tpu as pltpu

F32 = jnp.float32


# ------------------------------------------------------------------ helpers
def _tap_masks(h, w):
    """(9, H*W) float32 validity masks for the 9 taps of a 3x3 conv, pad=1."""
    p = jnp.arange(h * w, dtype=jnp.int32)
    hi = p // w
    wi = p % w
    ms = []
    for k in range(9):
        dh, dw = k // 3 - 1, k % 3 - 1
        valid = (hi + dh >= 0) & (hi + dh < h) & (wi + dw >= 0) & (wi + dw < w)
        ms.append(valid)
    return jnp.stack(ms, axis=0).astype(F32)


# ------------------------------------------------------------------ pallas
def feature_ext_pallas(x, w1, wd1, bd1, w2, w3, wd2, bd2, w4, wout):
    """Fused forward of feature_ext. x: (B, C, H, W) float32, NCHW."""
    b, c, h, w = x.shape
    hw = h * w
    out_c = wout.shape[0]
    cb = c * b                    # packed activation rows (channel-major)
    ob = out_c * b                # packed output rows
    rmax = max(cb, ob)

    # ---- pack activations channel-major onto sublanes: row r = c*B + b ----
    xp = jnp.transpose(x, (1, 0, 2, 3)).reshape(cb, hw).astype(F32)

    # ---- fold boundary masks into depthwise weights (host/XLA side) -------
    masks = _tap_masks(h, w)                                          # (9, HW)

    def fold_dw(wd):
        wd_rows = jnp.repeat(wd.reshape(c, 9).astype(F32), b, axis=0)  # (CB,9)
        return wd_rows.T[:, :, None] * masks[:, None, :]               # (9,CB,HW)

    mw = jnp.concatenate([fold_dw(wd1), fold_dw(wd2)], axis=0)         # (18,CB,HW)

    # ---- consolidate all tiny params into one (RMAX, NCOL) column slab ----
    def blockdiag_cols(wm, n_rows):
        # col_s[o*B + bb] = wm[o, s // B] if bb == s % B else 0
        o_idx = jnp.arange(n_rows) // b
        b_idx = jnp.arange(n_rows) % b
        return [jnp.where(b_idx == (s % b), wm[o_idx, s // b], 0.0)
                for s in range(cb)]

    cols = []
    for wm in (w1, w2, w3, w4):
        cols += blockdiag_cols(wm.astype(F32), cb)       # 4*CB columns
    cols += blockdiag_cols(wout.astype(F32), ob)         # CB columns (len OB)
    cols.append(jnp.repeat(bd1.astype(F32), b))          # bias columns
    cols.append(jnp.repeat(bd2.astype(F32), b))
    ncol = len(cols)
    bd1_j, bd2_j = 5 * cb, 5 * cb + 1

    def pad_col(col):
        return jnp.concatenate([col, jnp.zeros((rmax - col.shape[0],), F32)])
    params = jnp.stack([pad_col(cc) for cc in cols], axis=1)           # (RMAX,NCOL)

    taps = [(k // 3 - 1, k % 3 - 1) for k in range(9)]

    def kernel(x_ref, mw_ref, p_ref, o_ref):
        xv = x_ref[...]                       # (CB, HW), fully packed sublanes
        p = p_ref[...]                        # (RMAX, NCOL)

        def col(j, rows):
            return p[0:rows, j:j + 1]         # (rows, 1) coefficient column

        def pointwise(v, base, n_rows):
            # 1x1 conv as broadcast-MACs over the CB packed source rows
            # (pure VPU; MXU would be <2% utilized at this n_feat).
            acc = None
            for s in range(cb):
                term = col(base + s, n_rows) * v[s:s + 1, :]
                acc = term if acc is None else acc + term
            return acc

        def depthwise3x3(v, mw_base, bias_j):
            # per-channel 3x3, padding=1: 9 static lane rolls, masks pre-folded
            acc = None
            for k, (dh, dw) in enumerate(taps):
                s = dh * w + dw
                shifted = v if s == 0 else pltpu.roll(v, shift=(-s) % hw, axis=1)
                term = mw_ref[mw_base + k] * shifted
                acc = term if acc is None else acc + term
            return acc + col(bias_j, cb)

        def erf(v):
            # Abramowitz & Stegun 7.1.26 (max abs err ~1.5e-7); the divide is
            # an EUP approx reciprocal + one Newton step (rel err ~1e-7).
            a1, a2, a3, a4, a5 = (0.254829592, -0.284496736, 1.421413741,
                                  -1.453152027, 1.061405429)
            pc = 0.3275911
            av = jnp.abs(v)
            d = 1.0 + pc * av
            r0 = pl.reciprocal(d, approx=True)
            t = r0 * (2.0 - d * r0)
            poly = ((((a5 * t + a4) * t + a3) * t + a2) * t + a1) * t
            e = 1.0 - poly * jnp.exp(-av * av)
            return jnp.where(v >= 0, e, -e)

        def gelu(v):                          # exact (erf) GELU
            return 0.5 * v * (1.0 + erf(v * 0.7071067811865476))

        # body = conv1x1 -> GELU -> dw3x3 -> GELU -> conv1x1 -> conv1x1
        #        -> GELU -> dw3x3 -> GELU -> conv1x1 ; then +x, conv1, ReLU
        y = gelu(pointwise(xv, 0, cb))
        y = gelu(depthwise3x3(y, 0, bd1_j))
        y = pointwise(y, cb, cb)
        y = gelu(pointwise(y, 2 * cb, cb))
        y = gelu(depthwise3x3(y, 9, bd2_j))
        y = pointwise(y, 3 * cb, cb)
        y = y + xv                             # residual
        y = pointwise(y, 4 * cb, ob)           # conv1 (C -> output)
        o_ref[...] = jnp.maximum(y, 0.0).astype(o_ref.dtype)

    out = pl.pallas_call(
        kernel,
        out_shape=jax.ShapeDtypeStruct((ob, hw), x.dtype),
        grid=(1,),
        in_specs=[
            pl.BlockSpec((cb, hw), lambda i: (0, 0)),            # packed x
            pl.BlockSpec((18, cb, hw), lambda i: (0, 0, 0)),     # folded dw w.
            pl.BlockSpec((rmax, ncol), lambda i: (0, 0)),        # param columns
        ],
        out_specs=pl.BlockSpec((ob, hw), lambda i: (0, 0)),
        compiler_params=pltpu.CompilerParams(
            dimension_semantics=("arbitrary",)),
    )(xp, mw, params)

    # (OUT*B, HW) channel-major -> (B, OUT, H, W); tiny wrapper permute.
    return jnp.transpose(out.reshape(out_c, b, h, w), (1, 0, 2, 3))


# ------------------------------------------------------------------ reference
def feature_ext_ref(x, w1, wd1, bd1, w2, w3, wd2, bd2, w4, wout):
    """Pure-JAX reference matching the PyTorch module semantics (f32-exact)."""
    P = jax.lax.Precision.HIGHEST
    dn = ("NCHW", "OIHW", "NCHW")

    def conv1x1(v, wm):
        return jax.lax.conv_general_dilated(
            v, wm[:, :, None, None], (1, 1), "VALID",
            dimension_numbers=dn, precision=P)

    def dwconv3x3(v, wk, bk):
        y = jax.lax.conv_general_dilated(
            v, wk, (1, 1), ((1, 1), (1, 1)), dimension_numbers=dn,
            feature_group_count=v.shape[1], precision=P)
        return y + bk[None, :, None, None]

    g = lambda v: jax.nn.gelu(v, approximate=False)

    y = g(conv1x1(x, w1))
    y = g(dwconv3x3(y, wd1, bd1))
    y = conv1x1(y, w2)
    y = g(conv1x1(y, w3))
    y = g(dwconv3x3(y, wd2, bd2))
    y = conv1x1(y, w4)
    y = y + x
    y = conv1x1(y, wout)
    return jnp.maximum(y, 0.0)


# ------------------------------------------------------------------ main
if __name__ == "__main__":
    B, C, H, W, OUT = 2, 4, 16, 16, 8
    keys = jax.random.split(jax.random.PRNGKey(0), 10)
    scale = 0.3

    x = jax.random.normal(keys[0], (B, C, H, W), jnp.float32)
    w1 = scale * jax.random.normal(keys[1], (C, C), jnp.float32)
    wd1 = scale * jax.random.normal(keys[2], (C, 1, 3, 3), jnp.float32)
    bd1 = 0.1 * jax.random.normal(keys[3], (C,), jnp.float32)
    w2 = scale * jax.random.normal(keys[4], (C, C), jnp.float32)
    w3 = scale * jax.random.normal(keys[5], (C, C), jnp.float32)
    wd2 = scale * jax.random.normal(keys[6], (C, 1, 3, 3), jnp.float32)
    bd2 = 0.1 * jax.random.normal(keys[7], (C,), jnp.float32)
    w4 = scale * jax.random.normal(keys[8], (C, C), jnp.float32)
    wout = scale * jax.random.normal(keys[9], (OUT, C), jnp.float32)

    fn = jax.jit(feature_ext_pallas)
    out = jax.block_until_ready(fn(x, w1, wd1, bd1, w2, w3, wd2, bd2, w4, wout))

    ref = feature_ext_ref(x, w1, wd1, bd1, w2, w3, wd2, bd2, w4, wout)
    assert out.shape == (B, OUT, H, W)
    err = jnp.max(jnp.abs(out - ref))
    assert jnp.allclose(out, ref, atol=1e-4, rtol=1e-4), f"mismatch, max |diff|={err}"
    print("KERNEL_OK")
</pallas_src>

<mosaic_0001>
module attributes {stable_mosaic.version = 11 : i64} {
  func.func @kernel(%arg0: i32, %arg1: memref<8x256xf32, #tpu.memory_space<vmem>>, %arg2: memref<18x8x256xf32, #tpu.memory_space<vmem>>, %arg3: memref<16x42xf32, #tpu.memory_space<vmem>>, %arg4: memref<16x256xf32, #tpu.memory_space<vmem>>) attributes {dimension_semantics = [#tpu.dimension_semantics<arbitrary>], iteration_bounds = array<i64: 1>, scalar_prefetch = 0 : i64, scratch_operands = 0 : i64, tpu.core_type = #tpu.core_type<tc>, window_params = [{pipeline_mode = #tpu.pipeline_mode<synchronous>, transform_indices = @transform_0, window_bounds = array<i64: 8, 256>}, {pipeline_mode = #tpu.pipeline_mode<synchronous>, transform_indices = @transform_1, window_bounds = array<i64: 18, 8, 256>}, {pipeline_mode = #tpu.pipeline_mode<synchronous>, transform_indices = @transform_2, window_bounds = array<i64: 16, 42>}, {pipeline_mode = #tpu.pipeline_mode<synchronous>, transform_indices = @transform_3, window_bounds = array<i64: 16, 256>}]} {
    %c0 = arith.constant 0 : index
    %c0_0 = arith.constant 0 : index
    %0 = vector.load %arg1[%c0, %c0_0] : memref<8x256xf32, #tpu.memory_space<vmem>>, vector<8x256xf32>
    %c0_1 = arith.constant 0 : index
    %c0_2 = arith.constant 0 : index
    %1 = vector.load %arg3[%c0_1, %c0_2] : memref<16x42xf32, #tpu.memory_space<vmem>>, vector<16x42xf32>
    %2 = vector.extract_strided_slice %1 {offsets = [0, 0], sizes = [8, 1], strides = [1, 1]} : vector<16x42xf32> to vector<8x1xf32>
    %3 = vector.extract_strided_slice %0 {offsets = [0, 0], sizes = [1, 256], strides = [1, 1]} : vector<8x256xf32> to vector<1x256xf32>
    %4 = vector.broadcast %2 : vector<8x1xf32> to vector<8x256xf32>
    %5 = vector.broadcast %3 : vector<1x256xf32> to vector<8x256xf32>
    %6 = arith.mulf %4, %5 : vector<8x256xf32>
    %7 = vector.extract_strided_slice %1 {offsets = [0, 1], sizes = [8, 1], strides = [1, 1]} : vector<16x42xf32> to vector<8x1xf32>
    %8 = vector.extract_strided_slice %0 {offsets = [1, 0], sizes = [1, 256], strides = [1, 1]} : vector<8x256xf32> to vector<1x256xf32>
    %9 = vector.broadcast %7 : vector<8x1xf32> to vector<8x256xf32>
    %10 = vector.broadcast %8 : vector<1x256xf32> to vector<8x256xf32>
    %11 = arith.mulf %9, %10 : vector<8x256xf32>
    %12 = arith.addf %6, %11 : vector<8x256xf32>
    %13 = vector.extract_strided_slice %1 {offsets = [0, 2], sizes = [8, 1], strides = [1, 1]} : vector<16x42xf32> to vector<8x1xf32>
    %14 = vector.extract_strided_slice %0 {offsets = [2, 0], sizes = [1, 256], strides = [1, 1]} : vector<8x256xf32> to vector<1x256xf32>
    %15 = vector.broadcast %13 : vector<8x1xf32> to vector<8x256xf32>
    %16 = vector.broadcast %14 : vector<1x256xf32> to vector<8x256xf32>
    %17 = arith.mulf %15, %16 : vector<8x256xf32>
    %18 = arith.addf %12, %17 : vector<8x256xf32>
    %19 = vector.extract_strided_slice %1 {offsets = [0, 3], sizes = [8, 1], strides = [1, 1]} : vector<16x42xf32> to vector<8x1xf32>
    %20 = vector.extract_strided_slice %0 {offsets = [3, 0], sizes = [1, 256], strides = [1, 1]} : vector<8x256xf32> to vector<1x256xf32>
    %21 = vector.broadcast %19 : vector<8x1xf32> to vector<8x256xf32>
    %22 = vector.broadcast %20 : vector<1x256xf32> to vector<8x256xf32>
    %23 = arith.mulf %21, %22 : vector<8x256xf32>
    %24 = arith.addf %18, %23 : vector<8x256xf32>
    %25 = vector.extract_strided_slice %1 {offsets = [0, 4], sizes = [8, 1], strides = [1, 1]} : vector<16x42xf32> to vector<8x1xf32>
    %26 = vector.extract_strided_slice %0 {offsets = [4, 0], sizes = [1, 256], strides = [1, 1]} : vector<8x256xf32> to vector<1x256xf32>
    %27 = vector.broadcast %25 : vector<8x1xf32> to vector<8x256xf32>
    %28 = vector.broadcast %26 : vector<1x256xf32> to vector<8x256xf32>
    %29 = arith.mulf %27, %28 : vector<8x256xf32>
    %30 = arith.addf %24, %29 : vector<8x256xf32>
    %31 = vector.extract_strided_slice %1 {offsets = [0, 5], sizes = [8, 1], strides = [1, 1]} : vector<16x42xf32> to vector<8x1xf32>
    %32 = vector.extract_strided_slice %0 {offsets = [5, 0], sizes = [1, 256], strides = [1, 1]} : vector<8x256xf32> to vector<1x256xf32>
    %33 = vector.broadcast %31 : vector<8x1xf32> to vector<8x256xf32>
    %34 = vector.broadcast %32 : vector<1x256xf32> to vector<8x256xf32>
    %35 = arith.mulf %33, %34 : vector<8x256xf32>
    %36 = arith.addf %30, %35 : vector<8x256xf32>
    %37 = vector.extract_strided_slice %1 {offsets = [0, 6], sizes = [8, 1], strides = [1, 1]} : vector<16x42xf32> to vector<8x1xf32>
    %38 = vector.extract_strided_slice %0 {offsets = [6, 0], sizes = [1, 256], strides = [1, 1]} : vector<8x256xf32> to vector<1x256xf32>
    %39 = vector.broadcast %37 : vector<8x1xf32> to vector<8x256xf32>
    %40 = vector.broadcast %38 : vector<1x256xf32> to vector<8x256xf32>
    %41 = arith.mulf %39, %40 : vector<8x256xf32>
    %42 = arith.addf %36, %41 : vector<8x256xf32>
    %43 = vector.extract_strided_slice %1 {offsets = [0, 7], sizes = [8, 1], strides = [1, 1]} : vector<16x42xf32> to vector<8x1xf32>
    %44 = vector.extract_strided_slice %0 {offsets = [7, 0], sizes = [1, 256], strides = [1, 1]} : vector<8x256xf32> to vector<1x256xf32>
    %45 = vector.broadcast %43 : vector<8x1xf32> to vector<8x256xf32>
    %46 = vector.broadcast %44 : vector<1x256xf32> to vector<8x256xf32>
    %47 = arith.mulf %45, %46 : vector<8x256xf32>
    %48 = arith.addf %42, %47 : vector<8x256xf32>
    %cst = arith.constant 5.000000e-01 : f32
    %49 = vector.broadcast %cst : f32 to vector<8x256xf32>
    %50 = arith.mulf %49, %48 : vector<8x256xf32>
    %cst_3 = arith.constant 0.707106769 : f32
    %51 = vector.broadcast %cst_3 : f32 to vector<8x256xf32>
    %52 = arith.mulf %48, %51 : vector<8x256xf32>
    %53 = math.absf %52 : vector<8x256xf32>
    %cst_4 = arith.constant 0.327591091 : f32
    %54 = vector.broadcast %cst_4 : f32 to vector<8x256xf32>
    %55 = arith.mulf %54, %53 : vector<8x256xf32>
    %cst_5 = arith.constant 1.000000e+00 : f32
    %56 = vector.broadcast %cst_5 : f32 to vector<8x256xf32>
    %57 = arith.addf %56, %55 : vector<8x256xf32>
    %58 = tpu.reciprocal %57 {approx = true} : vector<8x256xf32> -> vector<8x256xf32>
    %59 = arith.mulf %57, %58 : vector<8x256xf32>
    %cst_6 = arith.constant 2.000000e+00 : f32
    %60 = vector.broadcast %cst_6 : f32 to vector<8x256xf32>
    %61 = arith.subf %60, %59 : vector<8x256xf32>
    %62 = arith.mulf %58, %61 : vector<8x256xf32>
    %cst_7 = arith.constant 1.06140542 : f32
    %63 = vector.broadcast %cst_7 : f32 to vector<8x256xf32>
    %64 = arith.mulf %63, %62 : vector<8x256xf32>
    %cst_8 = arith.constant -1.45315206 : f32
    %65 = vector.broadcast %cst_8 : f32 to vector<8x256xf32>
    %66 = arith.addf %64, %65 : vector<8x256xf32>
    %67 = arith.mulf %66, %62 : vector<8x256xf32>
    %cst_9 = arith.constant 1.42141378 : f32
    %68 = vector.broadcast %cst_9 : f32 to vector<8x256xf32>
    %69 = arith.addf %67, %68 : vector<8x256xf32>
    %70 = arith.mulf %69, %62 : vector<8x256xf32>
    %cst_10 = arith.constant -0.284496725 : f32
    %71 = vector.broadcast %cst_10 : f32 to vector<8x256xf32>
    %72 = arith.addf %70, %71 : vector<8x256xf32>
    %73 = arith.mulf %72, %62 : vector<8x256xf32>
    %cst_11 = arith.constant 0.254829586 : f32
    %74 = vector.broadcast %cst_11 : f32 to vector<8x256xf32>
    %75 = arith.addf %73, %74 : vector<8x256xf32>
    %76 = arith.mulf %75, %62 : vector<8x256xf32>
    %cst_12 = arith.constant 0.000000e+00 : f32
    %77 = vector.broadcast %cst_12 : f32 to vector<8x256xf32>
    %78 = arith.subf %77, %53 : vector<8x256xf32>
    %79 = arith.mulf %78, %53 : vector<8x256xf32>
    %80 = math.exp %79 : vector<8x256xf32>
    %81 = arith.mulf %76, %80 : vector<8x256xf32>
    %cst_13 = arith.constant 1.000000e+00 : f32
    %82 = vector.broadcast %cst_13 : f32 to vector<8x256xf32>
    %83 = arith.subf %82, %81 : vector<8x256xf32>
    %cst_14 = arith.constant 0.000000e+00 : f32
    %84 = vector.broadcast %cst_14 : f32 to vector<8x256xf32>
    %85 = arith.cmpf oge, %52, %84 : vector<8x256xf32>
    %cst_15 = arith.constant 0.000000e+00 : f32
    %86 = vector.broadcast %cst_15 : f32 to vector<8x256xf32>
    %87 = arith.subf %86, %83 : vector<8x256xf32>
    %88 = arith.select %85, %83, %87 : vector<8x256xi1>, vector<8x256xf32>
    %cst_16 = arith.constant 1.000000e+00 : f32
    %89 = vector.broadcast %cst_16 : f32 to vector<8x256xf32>
    %90 = arith.addf %89, %88 : vector<8x256xf32>
    %91 = arith.mulf %50, %90 : vector<8x256xf32>
    %c17_i32 = arith.constant 17 : i32
    %92 = tpu.dynamic_rotate %91 by %c17_i32 dim 1 : vector<8x256xf32>, i32 -> vector<8x256xf32>
    %c0_17 = arith.constant 0 : index
    %c0_18 = arith.constant 0 : index
    %c0_19 = arith.constant 0 : index
    %93 = vector.load %arg2[%c0_17, %c0_18, %c0_19] : memref<18x8x256xf32, #tpu.memory_space<vmem>>, vector<1x8x256xf32>
    %94 = vector.shape_cast %93 : vector<1x8x256xf32> to vector<8x256xf32>
    %95 = arith.mulf %94, %92 : vector<8x256xf32>
    %c16_i32 = arith.constant 16 : i32
    %96 = tpu.dynamic_rotate %91 by %c16_i32 dim 1 : vector<8x256xf32>, i32 -> vector<8x256xf32>
    %c1 = arith.constant 1 : index
    %c0_20 = arith.constant 0 : index
    %c0_21 = arith.constant 0 : index
    %97 = vector.load %arg2[%c1, %c0_20, %c0_21] : memref<18x8x256xf32, #tpu.memory_space<vmem>>, vector<1x8x256xf32>
    %98 = vector.shape_cast %97 : vector<1x8x256xf32> to vector<8x256xf32>
    %99 = arith.mulf %98, %96 : vector<8x256xf32>
    %100 = arith.addf %95, %99 : vector<8x256xf32>
    %c15_i32 = arith.constant 15 : i32
    %101 = tpu.dynamic_rotate %91 by %c15_i32 dim 1 : vector<8x256xf32>, i32 -> vector<8x256xf32>
    %c2 = arith.constant 2 : index
    %c0_22 = arith.constant 0 : index
    %c0_23 = arith.constant 0 : index
    %102 = vector.load %arg2[%c2, %c0_22, %c0_23] : memref<18x8x256xf32, #tpu.memory_space<vmem>>, vector<1x8x256xf32>
    %103 = vector.shape_cast %102 : vector<1x8x256xf32> to vector<8x256xf32>
    %104 = arith.mulf %103, %101 : vector<8x256xf32>
    %105 = arith.addf %100, %104 : vector<8x256xf32>
    %c1_i32 = arith.constant 1 : i32
    %106 = tpu.dynamic_rotate %91 by %c1_i32 dim 1 : vector<8x256xf32>, i32 -> vector<8x256xf32>
    %c3 = arith.constant 3 : index
    %c0_24 = arith.constant 0 : index
    %c0_25 = arith.constant 0 : index
    %107 = vector.load %arg2[%c3, %c0_24, %c0_25] : memref<18x8x256xf32, #tpu.memory_space<vmem>>, vector<1x8x256xf32>
    %108 = vector.shape_cast %107 : vector<1x8x256xf32> to vector<8x256xf32>
    %109 = arith.mulf %108, %106 : vector<8x256xf32>
    %110 = arith.addf %105, %109 : vector<8x256xf32>
    %c4 = arith.constant 4 : index
    %c0_26 = arith.constant 0 : index
    %c0_27 = arith.constant 0 : index
    %111 = vector.load %arg2[%c4, %c0_26, %c0_27] : memref<18x8x256xf32, #tpu.memory_space<vmem>>, vector<1x8x256xf32>
    %112 = vector.shape_cast %111 : vector<1x8x256xf32> to vector<8x256xf32>
    %113 = arith.mulf %112, %91 : vector<8x256xf32>
    %114 = arith.addf %110, %113 : vector<8x256xf32>
    %c255_i32 = arith.constant 255 : i32
    %115 = tpu.dynamic_rotate %91 by %c255_i32 dim 1 : vector<8x256xf32>, i32 -> vector<8x256xf32>
    %c5 = arith.constant 5 : index
    %c0_28 = arith.constant 0 : index
    %c0_29 = arith.constant 0 : index
    %116 = vector.load %arg2[%c5, %c0_28, %c0_29] : memref<18x8x256xf32, #tpu.memory_space<vmem>>, vector<1x8x256xf32>
    %117 = vector.shape_cast %116 : vector<1x8x256xf32> to vector<8x256xf32>
    %118 = arith.mulf %117, %115 : vector<8x256xf32>
    %119 = arith.addf %114, %118 : vector<8x256xf32>
    %c241_i32 = arith.constant 241 : i32
    %120 = tpu.dynamic_rotate %91 by %c241_i32 dim 1 : vector<8x256xf32>, i32 -> vector<8x256xf32>
    %c6 = arith.constant 6 : index
    %c0_30 = arith.constant 0 : index
    %c0_31 = arith.constant 0 : index
    %121 = vector.load %arg2[%c6, %c0_30, %c0_31] : memref<18x8x256xf32, #tpu.memory_space<vmem>>, vector<1x8x256xf32>
    %122 = vector.shape_cast %121 : vector<1x8x256xf32> to vector<8x256xf32>
    %123 = arith.mulf %122, %120 : vector<8x256xf32>
    %124 = arith.addf %119, %123 : vector<8x256xf32>
    %c240_i32 = arith.constant 240 : i32
    %125 = tpu.dynamic_rotate %91 by %c240_i32 dim 1 : vector<8x256xf32>, i32 -> vector<8x256xf32>
    %c7 = arith.constant 7 : index
    %c0_32 = arith.constant 0 : index
    %c0_33 = arith.constant 0 : index
    %126 = vector.load %arg2[%c7, %c0_32, %c0_33] : memref<18x8x256xf32, #tpu.memory_space<vmem>>, vector<1x8x256xf32>
    %127 = vector.shape_cast %126 : vector<1x8x256xf32> to vector<8x256xf32>
    %128 = arith.mulf %127, %125 : vector<8x256xf32>
    %129 = arith.addf %124, %128 : vector<8x256xf32>
    %c239_i32 = arith.constant 239 : i32
    %130 = tpu.dynamic_rotate %91 by %c239_i32 dim 1 : vector<8x256xf32>, i32 -> vector<8x256xf32>
    %c8 = arith.constant 8 : index
    %c0_34 = arith.constant 0 : index
    %c0_35 = arith.constant 0 : index
    %131 = vector.load %arg2[%c8, %c0_34, %c0_35] : memref<18x8x256xf32, #tpu.memory_space<vmem>>, vector<1x8x256xf32>
    %132 = vector.shape_cast %131 : vector<1x8x256xf32> to vector<8x256xf32>
    %133 = arith.mulf %132, %130 : vector<8x256xf32>
    %134 = arith.addf %129, %133 : vector<8x256xf32>
    %135 = vector.extract_strided_slice %1 {offsets = [0, 40], sizes = [8, 1], strides = [1, 1]} : vector<16x42xf32> to vector<8x1xf32>
    %136 = vector.broadcast %135 : vector<8x1xf32> to vector<8x256xf32>
    %137 = arith.addf %134, %136 : vector<8x256xf32>
    %cst_36 = arith.constant 5.000000e-01 : f32
    %138 = vector.broadcast %cst_36 : f32 to vector<8x256xf32>
    %139 = arith.mulf %138, %137 : vector<8x256xf32>
    %cst_37 = arith.constant 0.707106769 : f32
    %140 = vector.broadcast %cst_37 : f32 to vector<8x256xf32>
    %141 = arith.mulf %137, %140 : vector<8x256xf32>
    %142 = math.absf %141 : vector<8x256xf32>
    %cst_38 = arith.constant 0.327591091 : f32
    %143 = vector.broadcast %cst_38 : f32 to vector<8x256xf32>
    %144 = arith.mulf %143, %142 : vector<8x256xf32>
    %cst_39 = arith.constant 1.000000e+00 : f32
    %145 = vector.broadcast %cst_39 : f32 to vector<8x256xf32>
    %146 = arith.addf %145, %144 : vector<8x256xf32>
    %147 = tpu.reciprocal %146 {approx = true} : vector<8x256xf32> -> vector<8x256xf32>
    %148 = arith.mulf %146, %147 : vector<8x256xf32>
    %cst_40 = arith.constant 2.000000e+00 : f32
    %149 = vector.broadcast %cst_40 : f32 to vector<8x256xf32>
    %150 = arith.subf %149, %148 : vector<8x256xf32>
    %151 = arith.mulf %147, %150 : vector<8x256xf32>
    %cst_41 = arith.constant 1.06140542 : f32
    %152 = vector.broadcast %cst_41 : f32 to vector<8x256xf32>
    %153 = arith.mulf %152, %151 : vector<8x256xf32>
    %cst_42 = arith.constant -1.45315206 : f32
    %154 = vector.broadcast %cst_42 : f32 to vector<8x256xf32>
    %155 = arith.addf %153, %154 : vector<8x256xf32>
    %156 = arith.mulf %155, %151 : vector<8x256xf32>
    %cst_43 = arith.constant 1.42141378 : f32
    %157 = vector.broadcast %cst_43 : f32 to vector<8x256xf32>
    %158 = arith.addf %156, %157 : vector<8x256xf32>
    %159 = arith.mulf %158, %151 : vector<8x256xf32>
    %cst_44 = arith.constant -0.284496725 : f32
    %160 = vector.broadcast %cst_44 : f32 to vector<8x256xf32>
    %161 = arith.addf %159, %160 : vector<8x256xf32>
    %162 = arith.mulf %161, %151 : vector<8x256xf32>
    %cst_45 = arith.constant 0.254829586 : f32
    %163 = vector.broadcast %cst_45 : f32 to vector<8x256xf32>
    %164 = arith.addf %162, %163 : vector<8x256xf32>
    %165 = arith.mulf %164, %151 : vector<8x256xf32>
    %cst_46 = arith.constant 0.000000e+00 : f32
    %166 = vector.broadcast %cst_46 : f32 to vector<8x256xf32>
    %167 = arith.subf %166, %142 : vector<8x256xf32>
    %168 = arith.mulf %167, %142 : vector<8x256xf32>
    %169 = math.exp %168 : vector<8x256xf32>
    %170 = arith.mulf %165, %169 : vector<8x256xf32>
    %cst_47 = arith.constant 1.000000e+00 : f32
    %171 = vector.broadcast %cst_47 : f32 to vector<8x256xf32>
    %172 = arith.subf %171, %170 : vector<8x256xf32>
    %cst_48 = arith.constant 0.000000e+00 : f32
    %173 = vector.broadcast %cst_48 : f32 to vector<8x256xf32>
    %174 = arith.cmpf oge, %141, %173 : vector<8x256xf32>
    %cst_49 = arith.constant 0.000000e+00 : f32
    %175 = vector.broadcast %cst_49 : f32 to vector<8x256xf32>
    %176 = arith.subf %175, %172 : vector<8x256xf32>
    %177 = arith.select %174, %172, %176 : vector<8x256xi1>, vector<8x256xf32>
    %cst_50 = arith.constant 1.000000e+00 : f32
    %178 = vector.broadcast %cst_50 : f32 to vector<8x256xf32>
    %179 = arith.addf %178, %177 : vector<8x256xf32>
    %180 = arith.mulf %139, %179 : vector<8x256xf32>
    %181 = vector.extract_strided_slice %1 {offsets = [0, 8], sizes = [8, 1], strides = [1, 1]} : vector<16x42xf32> to vector<8x1xf32>
    %182 = vector.extract_strided_slice %180 {offsets = [0, 0], sizes = [1, 256], strides = [1, 1]} : vector<8x256xf32> to vector<1x256xf32>
    %183 = vector.broadcast %181 : vector<8x1xf32> to vector<8x256xf32>
    %184 = vector.broadcast %182 : vector<1x256xf32> to vector<8x256xf32>
    %185 = arith.mulf %183, %184 : vector<8x256xf32>
    %186 = vector.extract_strided_slice %1 {offsets = [0, 9], sizes = [8, 1], strides = [1, 1]} : vector<16x42xf32> to vector<8x1xf32>
    %187 = vector.extract_strided_slice %180 {offsets = [1, 0], sizes = [1, 256], strides = [1, 1]} : vector<8x256xf32> to vector<1x256xf32>
    %188 = vector.broadcast %186 : vector<8x1xf32> to vector<8x256xf32>
    %189 = vector.broadcast %187 : vector<1x256xf32> to vector<8x256xf32>
    %190 = arith.mulf %188, %189 : vector<8x256xf32>
    %191 = arith.addf %185, %190 : vector<8x256xf32>
    %192 = vector.extract_strided_slice %1 {offsets = [0, 10], sizes = [8, 1], strides = [1, 1]} : vector<16x42xf32> to vector<8x1xf32>
    %193 = vector.extract_strided_slice %180 {offsets = [2, 0], sizes = [1, 256], strides = [1, 1]} : vector<8x256xf32> to vector<1x256xf32>
    %194 = vector.broadcast %192 : vector<8x1xf32> to vector<8x256xf32>
    %195 = vector.broadcast %193 : vector<1x256xf32> to vector<8x256xf32>
    %196 = arith.mulf %194, %195 : vector<8x256xf32>
    %197 = arith.addf %191, %196 : vector<8x256xf32>
    %198 = vector.extract_strided_slice %1 {offsets = [0, 11], sizes = [8, 1], strides = [1, 1]} : vector<16x42xf32> to vector<8x1xf32>
    %199 = vector.extract_strided_slice %180 {offsets = [3, 0], sizes = [1, 256], strides = [1, 1]} : vector<8x256xf32> to vector<1x256xf32>
    %200 = vector.broadcast %198 : vector<8x1xf32> to vector<8x256xf32>
    %201 = vector.broadcast %199 : vector<1x256xf32> to vector<8x256xf32>
    %202 = arith.mulf %200, %201 : vector<8x256xf32>
    %203 = arith.addf %197, %202 : vector<8x256xf32>
    %204 = vector.extract_strided_slice %1 {offsets = [0, 12], sizes = [8, 1], strides = [1, 1]} : vector<16x42xf32> to vector<8x1xf32>
    %205 = vector.extract_strided_slice %180 {offsets = [4, 0], sizes = [1, 256], strides = [1, 1]} : vector<8x256xf32> to vector<1x256xf32>
    %206 = vector.broadcast %204 : vector<8x1xf32> to vector<8x256xf32>
    %207 = vector.broadcast %205 : vector<1x256xf32> to vector<8x256xf32>
    %208 = arith.mulf %206, %207 : vector<8x256xf32>
    %209 = arith.addf %203, %208 : vector<8x256xf32>
    %210 = vector.extract_strided_slice %1 {offsets = [0, 13], sizes = [8, 1], strides = [1, 1]} : vector<16x42xf32> to vector<8x1xf32>
    %211 = vector.extract_strided_slice %180 {offsets = [5, 0], sizes = [1, 256], strides = [1, 1]} : vector<8x256xf32> to vector<1x256xf32>
    %212 = vector.broadcast %210 : vector<8x1xf32> to vector<8x256xf32>
    %213 = vector.broadcast %211 : vector<1x256xf32> to vector<8x256xf32>
    %214 = arith.mulf %212, %213 : vector<8x256xf32>
    %215 = arith.addf %209, %214 : vector<8x256xf32>
    %216 = vector.extract_strided_slice %1 {offsets = [0, 14], sizes = [8, 1], strides = [1, 1]} : vector<16x42xf32> to vector<8x1xf32>
    %217 = vector.extract_strided_slice %180 {offsets = [6, 0], sizes = [1, 256], strides = [1, 1]} : vector<8x256xf32> to vector<1x256xf32>
    %218 = vector.broadcast %216 : vector<8x1xf32> to vector<8x256xf32>
    %219 = vector.broadcast %217 : vector<1x256xf32> to vector<8x256xf32>
    %220 = arith.mulf %218, %219 : vector<8x256xf32>
    %221 = arith.addf %215, %220 : vector<8x256xf32>
    %222 = vector.extract_strided_slice %1 {offsets = [0, 15], sizes = [8, 1], strides = [1, 1]} : vector<16x42xf32> to vector<8x1xf32>
    %223 = vector.extract_strided_slice %180 {offsets = [7, 0], sizes = [1, 256], strides = [1, 1]} : vector<8x256xf32> to vector<1x256xf32>
    %224 = vector.broadcast %222 : vector<8x1xf32> to vector<8x256xf32>
    %225 = vector.broadcast %223 : vector<1x256xf32> to vector<8x256xf32>
    %226 = arith.mulf %224, %225 : vector<8x256xf32>
    %227 = arith.addf %221, %226 : vector<8x256xf32>
    %228 = vector.extract_strided_slice %1 {offsets = [0, 16], sizes = [8, 1], strides = [1, 1]} : vector<16x42xf32> to vector<8x1xf32>
    %229 = vector.extract_strided_slice %227 {offsets = [0, 0], sizes = [1, 256], strides = [1, 1]} : vector<8x256xf32> to vector<1x256xf32>
    %230 = vector.broadcast %228 : vector<8x1xf32> to vector<8x256xf32>
    %231 = vector.broadcast %229 : vector<1x256xf32> to vector<8x256xf32>
    %232 = arith.mulf %230, %231 : vector<8x256xf32>
    %233 = vector.extract_strided_slice %1 {offsets = [0, 17], sizes = [8, 1], strides = [1, 1]} : vector<16x42xf32> to vector<8x1xf32>
    %234 = vector.extract_strided_slice %227 {offsets = [1, 0], sizes = [1, 256], strides = [1, 1]} : vector<8x256xf32> to vector<1x256xf32>
    %235 = vector.broadcast %233 : vector<8x1xf32> to vector<8x256xf32>
    %236 = vector.broadcast %234 : vector<1x256xf32> to vector<8x256xf32>
    %237 = arith.mulf %235, %236 : vector<8x256xf32>
    %238 = arith.addf %232, %237 : vector<8x256xf32>
    %239 = vector.extract_strided_slice %1 {offsets = [0, 18], sizes = [8, 1], strides = [1, 1]} : vector<16x42xf32> to vector<8x1xf32>
    %240 = vector.extract_strided_slice %227 {offsets = [2, 0], sizes = [1, 256], strides = [1, 1]} : vector<8x256xf32> to vector<1x256xf32>
    %241 = vector.broadcast %239 : vector<8x1xf32> to vector<8x256xf32>
    %242 = vector.broadcast %240 : vector<1x256xf32> to vector<8x256xf32>
    %243 = arith.mulf %241, %242 : vector<8x256xf32>
    %244 = arith.addf %238, %243 : vector<8x256xf32>
    %245 = vector.extract_strided_slice %1 {offsets = [0, 19], sizes = [8, 1], strides = [1, 1]} : vector<16x42xf32> to vector<8x1xf32>
    %246 = vector.extract_strided_slice %227 {offsets = [3, 0], sizes = [1, 256], strides = [1, 1]} : vector<8x256xf32> to vector<1x256xf32>
    %247 = vector.broadcast %245 : vector<8x1xf32> to vector<8x256xf32>
    %248 = vector.broadcast %246 : vector<1x256xf32> to vector<8x256xf32>
    %249 = arith.mulf %247, %248 : vector<8x256xf32>
    %250 = arith.addf %244, %249 : vector<8x256xf32>
    %251 = vector.extract_strided_slice %1 {offsets = [0, 20], sizes = [8, 1], strides = [1, 1]} : vector<16x42xf32> to vector<8x1xf32>
    %252 = vector.extract_strided_slice %227 {offsets = [4, 0], sizes = [1, 256], strides = [1, 1]} : vector<8x256xf32> to vector<1x256xf32>
    %253 = vector.broadcast %251 : vector<8x1xf32> to vector<8x256xf32>
    %254 = vector.broadcast %252 : vector<1x256xf32> to vector<8x256xf32>
    %255 = arith.mulf %253, %254 : vector<8x256xf32>
    %256 = arith.addf %250, %255 : vector<8x256xf32>
    %257 = vector.extract_strided_slice %1 {offsets = [0, 21], sizes = [8, 1], strides = [1, 1]} : vector<16x42xf32> to vector<8x1xf32>
    %258 = vector.extract_strided_slice %227 {offsets = [5, 0], sizes = [1, 256], strides = [1, 1]} : vector<8x256xf32> to vector<1x256xf32>
    %259 = vector.broadcast %257 : vector<8x1xf32> to vector<8x256xf32>
    %260 = vector.broadcast %258 : vector<1x256xf32> to vector<8x256xf32>
    %261 = arith.mulf %259, %260 : vector<8x256xf32>
    %262 = arith.addf %256, %261 : vector<8x256xf32>
    %263 = vector.extract_strided_slice %1 {offsets = [0, 22], sizes = [8, 1], strides = [1, 1]} : vector<16x42xf32> to vector<8x1xf32>
    %264 = vector.extract_strided_slice %227 {offsets = [6, 0], sizes = [1, 256], strides = [1, 1]} : vector<8x256xf32> to vector<1x256xf32>
    %265 = vector.broadcast %263 : vector<8x1xf32> to vector<8x256xf32>
    %266 = vector.broadcast %264 : vector<1x256xf32> to vector<8x256xf32>
    %267 = arith.mulf %265, %266 : vector<8x256xf32>
    %268 = arith.addf %262, %267 : vector<8x256xf32>
    %269 = vector.extract_strided_slice %1 {offsets = [0, 23], sizes = [8, 1], strides = [1, 1]} : vector<16x42xf32> to vector<8x1xf32>
    %270 = vector.extract_strided_slice %227 {offsets = [7, 0], sizes = [1, 256], strides = [1, 1]} : vector<8x256xf32> to vector<1x256xf32>
    %271 = vector.broadcast %269 : vector<8x1xf32> to vector<8x256xf32>
    %272 = vector.broadcast %270 : vector<1x256xf32> to vector<8x256xf32>
    %273 = arith.mulf %271, %272 : vector<8x256xf32>
    %274 = arith.addf %268, %273 : vector<8x256xf32>
    %cst_51 = arith.constant 5.000000e-01 : f32
    %275 = vector.broadcast %cst_51 : f32 to vector<8x256xf32>
    %276 = arith.mulf %275, %274 : vector<8x256xf32>
    %cst_52 = arith.constant 0.707106769 : f32
    %277 = vector.broadcast %cst_52 : f32 to vector<8x256xf32>
    %278 = arith.mulf %274, %277 : vector<8x256xf32>
    %279 = math.absf %278 : vector<8x256xf32>
    %cst_53 = arith.constant 0.327591091 : f32
    %280 = vector.broadcast %cst_53 : f32 to vector<8x256xf32>
    %281 = arith.mulf %280, %279 : vector<8x256xf32>
    %cst_54 = arith.constant 1.000000e+00 : f32
    %282 = vector.broadcast %cst_54 : f32 to vector<8x256xf32>
    %283 = arith.addf %282, %281 : vector<8x256xf32>
    %284 = tpu.reciprocal %283 {approx = true} : vector<8x256xf32> -> vector<8x256xf32>
    %285 = arith.mulf %283, %284 : vector<8x256xf32>
    %cst_55 = arith.constant 2.000000e+00 : f32
    %286 = vector.broadcast %cst_55 : f32 to vector<8x256xf32>
    %287 = arith.subf %286, %285 : vector<8x256xf32>
    %288 = arith.mulf %284, %287 : vector<8x256xf32>
    %cst_56 = arith.constant 1.06140542 : f32
    %289 = vector.broadcast %cst_56 : f32 to vector<8x256xf32>
    %290 = arith.mulf %289, %288 : vector<8x256xf32>
    %cst_57 = arith.constant -1.45315206 : f32
    %291 = vector.broadcast %cst_57 : f32 to vector<8x256xf32>
    %292 = arith.addf %290, %291 : vector<8x256xf32>
    %293 = arith.mulf %292, %288 : vector<8x256xf32>
    %cst_58 = arith.constant 1.42141378 : f32
    %294 = vector.broadcast %cst_58 : f32 to vector<8x256xf32>
    %295 = arith.addf %293, %294 : vector<8x256xf32>
    %296 = arith.mulf %295, %288 : vector<8x256xf32>
    %cst_59 = arith.constant -0.284496725 : f32
    %297 = vector.broadcast %cst_59 : f32 to vector<8x256xf32>
    %298 = arith.addf %296, %297 : vector<8x256xf32>
    %299 = arith.mulf %298, %288 : vector<8x256xf32>
    %cst_60 = arith.constant 0.254829586 : f32
    %300 = vector.broadcast %cst_60 : f32 to vector<8x256xf32>
    %301 = arith.addf %299, %300 : vector<8x256xf32>
    %302 = arith.mulf %301, %288 : vector<8x256xf32>
    %cst_61 = arith.constant 0.000000e+00 : f32
    %303 = vector.broadcast %cst_61 : f32 to vector<8x256xf32>
    %304 = arith.subf %303, %279 : vector<8x256xf32>
    %305 = arith.mulf %304, %279 : vector<8x256xf32>
    %306 = math.exp %305 : vector<8x256xf32>
    %307 = arith.mulf %302, %306 : vector<8x256xf32>
    %cst_62 = arith.constant 1.000000e+00 : f32
    %308 = vector.broadcast %cst_62 : f32 to vector<8x256xf32>
    %309 = arith.subf %308, %307 : vector<8x256xf32>
    %cst_63 = arith.constant 0.000000e+00 : f32
    %310 = vector.broadcast %cst_63 : f32 to vector<8x256xf32>
    %311 = arith.cmpf oge, %278, %310 : vector<8x256xf32>
    %cst_64 = arith.constant 0.000000e+00 : f32
    %312 = vector.broadcast %cst_64 : f32 to vector<8x256xf32>
    %313 = arith.subf %312, %309 : vector<8x256xf32>
    %314 = arith.select %311, %309, %313 : vector<8x256xi1>, vector<8x256xf32>
    %cst_65 = arith.constant 1.000000e+00 : f32
    %315 = vector.broadcast %cst_65 : f32 to vector<8x256xf32>
    %316 = arith.addf %315, %314 : vector<8x256xf32>
    %317 = arith.mulf %276, %316 : vector<8x256xf32>
    %c17_i32_66 = arith.constant 17 : i32
    %318 = tpu.dynamic_rotate %317 by %c17_i32_66 dim 1 : vector<8x256xf32>, i32 -> vector<8x256xf32>
    %c9 = arith.constant 9 : index
    %c0_67 = arith.constant 0 : index
    %c0_68 = arith.constant 0 : index
    %319 = vector.load %arg2[%c9, %c0_67, %c0_68] : memref<18x8x256xf32, #tpu.memory_space<vmem>>, vector<1x8x256xf32>
    %320 = vector.shape_cast %319 : vector<1x8x256xf32> to vector<8x256xf32>
    %321 = arith.mulf %320, %318 : vector<8x256xf32>
    %c16_i32_69 = arith.constant 16 : i32
    %322 = tpu.dynamic_rotate %317 by %c16_i32_69 dim 1 : vector<8x256xf32>, i32 -> vector<8x256xf32>
    %c10 = arith.constant 10 : index
    %c0_70 = arith.constant 0 : index
    %c0_71 = arith.constant 0 : index
    %323 = vector.load %arg2[%c10, %c0_70, %c0_71] : memref<18x8x256xf32, #tpu.memory_space<vmem>>, vector<1x8x256xf32>
    %324 = vector.shape_cast %323 : vector<1x8x256xf32> to vector<8x256xf32>
    %325 = arith.mulf %324, %322 : vector<8x256xf32>
    %326 = arith.addf %321, %325 : vector<8x256xf32>
    %c15_i32_72 = arith.constant 15 : i32
    %327 = tpu.dynamic_rotate %317 by %c15_i32_72 dim 1 : vector<8x256xf32>, i32 -> vector<8x256xf32>
    %c11 = arith.constant 11 : index
    %c0_73 = arith.constant 0 : index
    %c0_74 = arith.constant 0 : index
    %328 = vector.load %arg2[%c11, %c0_73, %c0_74] : memref<18x8x256xf32, #tpu.memory_space<vmem>>, vector<1x8x256xf32>
    %329 = vector.shape_cast %328 : vector<1x8x256xf32> to vector<8x256xf32>
    %330 = arith.mulf %329, %327 : vector<8x256xf32>
    %331 = arith.addf %326, %330 : vector<8x256xf32>
    %c1_i32_75 = arith.constant 1 : i32
    %332 = tpu.dynamic_rotate %317 by %c1_i32_75 dim 1 : vector<8x256xf32>, i32 -> vector<8x256xf32>
    %c12 = arith.constant 12 : index
    %c0_76 = arith.constant 0 : index
    %c0_77 = arith.constant 0 : index
    %333 = vector.load %arg2[%c12, %c0_76, %c0_77] : memref<18x8x256xf32, #tpu.memory_space<vmem>>, vector<1x8x256xf32>
    %334 = vector.shape_cast %333 : vector<1x8x256xf32> to vector<8x256xf32>
    %335 = arith.mulf %334, %332 : vector<8x256xf32>
    %336 = arith.addf %331, %335 : vector<8x256xf32>
    %c13 = arith.constant 13 : index
    %c0_78 = arith.constant 0 : index
    %c0_79 = arith.constant 0 : index
    %337 = vector.load %arg2[%c13, %c0_78, %c0_79] : memref<18x8x256xf32, #tpu.memory_space<vmem>>, vector<1x8x256xf32>
    %338 = vector.shape_cast %337 : vector<1x8x256xf32> to vector<8x256xf32>
    %339 = arith.mulf %338, %317 : vector<8x256xf32>
    %340 = arith.addf %336, %339 : vector<8x256xf32>
    %c255_i32_80 = arith.constant 255 : i32
    %341 = tpu.dynamic_rotate %317 by %c255_i32_80 dim 1 : vector<8x256xf32>, i32 -> vector<8x256xf32>
    %c14 = arith.constant 14 : index
    %c0_81 = arith.constant 0 : index
    %c0_82 = arith.constant 0 : index
    %342 = vector.load %arg2[%c14, %c0_81, %c0_82] : memref<18x8x256xf32, #tpu.memory_space<vmem>>, vector<1x8x256xf32>
    %343 = vector.shape_cast %342 : vector<1x8x256xf32> to vector<8x256xf32>
    %344 = arith.mulf %343, %341 : vector<8x256xf32>
    %345 = arith.addf %340, %344 : vector<8x256xf32>
    %c241_i32_83 = arith.constant 241 : i32
    %346 = tpu.dynamic_rotate %317 by %c241_i32_83 dim 1 : vector<8x256xf32>, i32 -> vector<8x256xf32>
    %c15 = arith.constant 15 : index
    %c0_84 = arith.constant 0 : index
    %c0_85 = arith.constant 0 : index
    %347 = vector.load %arg2[%c15, %c0_84, %c0_85] : memref<18x8x256xf32, #tpu.memory_space<vmem>>, vector<1x8x256xf32>
    %348 = vector.shape_cast %347 : vector<1x8x256xf32> to vector<8x256xf32>
    %349 = arith.mulf %348, %346 : vector<8x256xf32>
    %350 = arith.addf %345, %349 : vector<8x256xf32>
    %c240_i32_86 = arith.constant 240 : i32
    %351 = tpu.dynamic_rotate %317 by %c240_i32_86 dim 1 : vector<8x256xf32>, i32 -> vector<8x256xf32>
    %c16 = arith.constant 16 : index
    %c0_87 = arith.constant 0 : index
    %c0_88 = arith.constant 0 : index
    %352 = vector.load %arg2[%c16, %c0_87, %c0_88] : memref<18x8x256xf32, #tpu.memory_space<vmem>>, vector<1x8x256xf32>
    %353 = vector.shape_cast %352 : vector<1x8x256xf32> to vector<8x256xf32>
    %354 = arith.mulf %353, %351 : vector<8x256xf32>
    %355 = arith.addf %350, %354 : vector<8x256xf32>
    %c239_i32_89 = arith.constant 239 : i32
    %356 = tpu.dynamic_rotate %317 by %c239_i32_89 dim 1 : vector<8x256xf32>, i32 -> vector<8x256xf32>
    %c17 = arith.constant 17 : index
    %c0_90 = arith.constant 0 : index
    %c0_91 = arith.constant 0 : index
    %357 = vector.load %arg2[%c17, %c0_90, %c0_91] : memref<18x8x256xf32, #tpu.memory_space<vmem>>, vector<1x8x256xf32>
    %358 = vector.shape_cast %357 : vector<1x8x256xf32> to vector<8x256xf32>
    %359 = arith.mulf %358, %356 : vector<8x256xf32>
    %360 = arith.addf %355, %359 : vector<8x256xf32>
    %361 = vector.extract_strided_slice %1 {offsets = [0, 41], sizes = [8, 1], strides = [1, 1]} : vector<16x42xf32> to vector<8x1xf32>
    %362 = vector.broadcast %361 : vector<8x1xf32> to vector<8x256xf32>
    %363 = arith.addf %360, %362 : vector<8x256xf32>
    %cst_92 = arith.constant 5.000000e-01 : f32
    %364 = vector.broadcast %cst_92 : f32 to vector<8x256xf32>
    %365 = arith.mulf %364, %363 : vector<8x256xf32>
    %cst_93 = arith.constant 0.707106769 : f32
    %366 = vector.broadcast %cst_93 : f32 to vector<8x256xf32>
    %367 = arith.mulf %363, %366 : vector<8x256xf32>
    %368 = math.absf %367 : vector<8x256xf32>
    %cst_94 = arith.constant 0.327591091 : f32
    %369 = vector.broadcast %cst_94 : f32 to vector<8x256xf32>
    %370 = arith.mulf %369, %368 : vector<8x256xf32>
    %cst_95 = arith.constant 1.000000e+00 : f32
    %371 = vector.broadcast %cst_95 : f32 to vector<8x256xf32>
    %372 = arith.addf %371, %370 : vector<8x256xf32>
    %373 = tpu.reciprocal %372 {approx = true} : vector<8x256xf32> -> vector<8x256xf32>
    %374 = arith.mulf %372, %373 : vector<8x256xf32>
    %cst_96 = arith.constant 2.000000e+00 : f32
    %375 = vector.broadcast %cst_96 : f32 to vector<8x256xf32>
    %376 = arith.subf %375, %374 : vector<8x256xf32>
    %377 = arith.mulf %373, %376 : vector<8x256xf32>
    %cst_97 = arith.constant 1.06140542 : f32
    %378 = vector.broadcast %cst_97 : f32 to vector<8x256xf32>
    %379 = arith.mulf %378, %377 : vector<8x256xf32>
    %cst_98 = arith.constant -1.45315206 : f32
    %380 = vector.broadcast %cst_98 : f32 to vector<8x256xf32>
    %381 = arith.addf %379, %380 : vector<8x256xf32>
    %382 = arith.mulf %381, %377 : vector<8x256xf32>
    %cst_99 = arith.constant 1.42141378 : f32
    %383 = vector.broadcast %cst_99 : f32 to vector<8x256xf32>
    %384 = arith.addf %382, %383 : vector<8x256xf32>
    %385 = arith.mulf %384, %377 : vector<8x256xf32>
    %cst_100 = arith.constant -0.284496725 : f32
    %386 = vector.broadcast %cst_100 : f32 to vector<8x256xf32>
    %387 = arith.addf %385, %386 : vector<8x256xf32>
    %388 = arith.mulf %387, %377 : vector<8x256xf32>
    %cst_101 = arith.constant 0.254829586 : f32
    %389 = vector.broadcast %cst_101 : f32 to vector<8x256xf32>
    %390 = arith.addf %388, %389 : vector<8x256xf32>
    %391 = arith.mulf %390, %377 : vector<8x256xf32>
    %cst_102 = arith.constant 0.000000e+00 : f32
    %392 = vector.broadcast %cst_102 : f32 to vector<8x256xf32>
    %393 = arith.subf %392, %368 : vector<8x256xf32>
    %394 = arith.mulf %393, %368 : vector<8x256xf32>
    %395 = math.exp %394 : vector<8x256xf32>
    %396 = arith.mulf %391, %395 : vector<8x256xf32>
    %cst_103 = arith.constant 1.000000e+00 : f32
    %397 = vector.broadcast %cst_103 : f32 to vector<8x256xf32>
    %398 = arith.subf %397, %396 : vector<8x256xf32>
    %cst_104 = arith.constant 0.000000e+00 : f32
    %399 = vector.broadcast %cst_104 : f32 to vector<8x256xf32>
    %400 = arith.cmpf oge, %367, %399 : vector<8x256xf32>
    %cst_105 = arith.constant 0.000000e+00 : f32
    %401 = vector.broadcast %cst_105 : f32 to vector<8x256xf32>
    %402 = arith.subf %401, %398 : vector<8x256xf32>
    %403 = arith.select %400, %398, %402 : vector<8x256xi1>, vector<8x256xf32>
    %cst_106 = arith.constant 1.000000e+00 : f32
    %404 = vector.broadcast %cst_106 : f32 to vector<8x256xf32>
    %405 = arith.addf %404, %403 : vector<8x256xf32>
    %406 = arith.mulf %365, %405 : vector<8x256xf32>
    %407 = vector.extract_strided_slice %1 {offsets = [0, 24], sizes = [8, 1], strides = [1, 1]} : vector<16x42xf32> to vector<8x1xf32>
    %408 = vector.extract_strided_slice %406 {offsets = [0, 0], sizes = [1, 256], strides = [1, 1]} : vector<8x256xf32> to vector<1x256xf32>
    %409 = vector.broadcast %407 : vector<8x1xf32> to vector<8x256xf32>
    %410 = vector.broadcast %408 : vector<1x256xf32> to vector<8x256xf32>
    %411 = arith.mulf %409, %410 : vector<8x256xf32>
    %412 = vector.extract_strided_slice %1 {offsets = [0, 25], sizes = [8, 1], strides = [1, 1]} : vector<16x42xf32> to vector<8x1xf32>
    %413 = vector.extract_strided_slice %406 {offsets = [1, 0], sizes = [1, 256], strides = [1, 1]} : vector<8x256xf32> to vector<1x256xf32>
    %414 = vector.broadcast %412 : vector<8x1xf32> to vector<8x256xf32>
    %415 = vector.broadcast %413 : vector<1x256xf32> to vector<8x256xf32>
    %416 = arith.mulf %414, %415 : vector<8x256xf32>
    %417 = arith.addf %411, %416 : vector<8x256xf32>
    %418 = vector.extract_strided_slice %1 {offsets = [0, 26], sizes = [8, 1], strides = [1, 1]} : vector<16x42xf32> to vector<8x1xf32>
    %419 = vector.extract_strided_slice %406 {offsets = [2, 0], sizes = [1, 256], strides = [1, 1]} : vector<8x256xf32> to vector<1x256xf32>
    %420 = vector.broadcast %418 : vector<8x1xf32> to vector<8x256xf32>
    %421 = vector.broadcast %419 : vector<1x256xf32> to vector<8x256xf32>
    %422 = arith.mulf %420, %421 : vector<8x256xf32>
    %423 = arith.addf %417, %422 : vector<8x256xf32>
    %424 = vector.extract_strided_slice %1 {offsets = [0, 27], sizes = [8, 1], strides = [1, 1]} : vector<16x42xf32> to vector<8x1xf32>
    %425 = vector.extract_strided_slice %406 {offsets = [3, 0], sizes = [1, 256], strides = [1, 1]} : vector<8x256xf32> to vector<1x256xf32>
    %426 = vector.broadcast %424 : vector<8x1xf32> to vector<8x256xf32>
    %427 = vector.broadcast %425 : vector<1x256xf32> to vector<8x256xf32>
    %428 = arith.mulf %426, %427 : vector<8x256xf32>
    %429 = arith.addf %423, %428 : vector<8x256xf32>
    %430 = vector.extract_strided_slice %1 {offsets = [0, 28], sizes = [8, 1], strides = [1, 1]} : vector<16x42xf32> to vector<8x1xf32>
    %431 = vector.extract_strided_slice %406 {offsets = [4, 0], sizes = [1, 256], strides = [1, 1]} : vector<8x256xf32> to vector<1x256xf32>
    %432 = vector.broadcast %430 : vector<8x1xf32> to vector<8x256xf32>
    %433 = vector.broadcast %431 : vector<1x256xf32> to vector<8x256xf32>
    %434 = arith.mulf %432, %433 : vector<8x256xf32>
    %435 = arith.addf %429, %434 : vector<8x256xf32>
    %436 = vector.extract_strided_slice %1 {offsets = [0, 29], sizes = [8, 1], strides = [1, 1]} : vector<16x42xf32> to vector<8x1xf32>
    %437 = vector.extract_strided_slice %406 {offsets = [5, 0], sizes = [1, 256], strides = [1, 1]} : vector<8x256xf32> to vector<1x256xf32>
    %438 = vector.broadcast %436 : vector<8x1xf32> to vector<8x256xf32>
    %439 = vector.broadcast %437 : vector<1x256xf32> to vector<8x256xf32>
    %440 = arith.mulf %438, %439 : vector<8x256xf32>
    %441 = arith.addf %435, %440 : vector<8x256xf32>
    %442 = vector.extract_strided_slice %1 {offsets = [0, 30], sizes = [8, 1], strides = [1, 1]} : vector<16x42xf32> to vector<8x1xf32>
    %443 = vector.extract_strided_slice %406 {offsets = [6, 0], sizes = [1, 256], strides = [1, 1]} : vector<8x256xf32> to vector<1x256xf32>
    %444 = vector.broadcast %442 : vector<8x1xf32> to vector<8x256xf32>
    %445 = vector.broadcast %443 : vector<1x256xf32> to vector<8x256xf32>
    %446 = arith.mulf %444, %445 : vector<8x256xf32>
    %447 = arith.addf %441, %446 : vector<8x256xf32>
    %448 = vector.extract_strided_slice %1 {offsets = [0, 31], sizes = [8, 1], strides = [1, 1]} : vector<16x42xf32> to vector<8x1xf32>
    %449 = vector.extract_strided_slice %406 {offsets = [7, 0], sizes = [1, 256], strides = [1, 1]} : vector<8x256xf32> to vector<1x256xf32>
    %450 = vector.broadcast %448 : vector<8x1xf32> to vector<8x256xf32>
    %451 = vector.broadcast %449 : vector<1x256xf32> to vector<8x256xf32>
    %452 = arith.mulf %450, %451 : vector<8x256xf32>
    %453 = arith.addf %447, %452 : vector<8x256xf32>
    %454 = arith.addf %453, %0 : vector<8x256xf32>
    %455 = vector.extract_strided_slice %1 {offsets = [0, 32], sizes = [16, 1], strides = [1, 1]} : vector<16x42xf32> to vector<16x1xf32>
    %456 = vector.extract_strided_slice %454 {offsets = [0, 0], sizes = [1, 256], strides = [1, 1]} : vector<8x256xf32> to vector<1x256xf32>
    %457 = vector.broadcast %455 : vector<16x1xf32> to vector<16x256xf32>
    %458 = vector.broadcast %456 : vector<1x256xf32> to vector<16x256xf32>
    %459 = arith.mulf %457, %458 : vector<16x256xf32>
    %460 = vector.extract_strided_slice %1 {offsets = [0, 33], sizes = [16, 1], strides = [1, 1]} : vector<16x42xf32> to vector<16x1xf32>
    %461 = vector.extract_strided_slice %454 {offsets = [1, 0], sizes = [1, 256], strides = [1, 1]} : vector<8x256xf32> to vector<1x256xf32>
    %462 = vector.broadcast %460 : vector<16x1xf32> to vector<16x256xf32>
    %463 = vector.broadcast %461 : vector<1x256xf32> to vector<16x256xf32>
    %464 = arith.mulf %462, %463 : vector<16x256xf32>
    %465 = arith.addf %459, %464 : vector<16x256xf32>
    %466 = vector.extract_strided_slice %1 {offsets = [0, 34], sizes = [16, 1], strides = [1, 1]} : vector<16x42xf32> to vector<16x1xf32>
    %467 = vector.extract_strided_slice %454 {offsets = [2, 0], sizes = [1, 256], strides = [1, 1]} : vector<8x256xf32> to vector<1x256xf32>
    %468 = vector.broadcast %466 : vector<16x1xf32> to vector<16x256xf32>
    %469 = vector.broadcast %467 : vector<1x256xf32> to vector<16x256xf32>
    %470 = arith.mulf %468, %469 : vector<16x256xf32>
    %471 = arith.addf %465, %470 : vector<16x256xf32>
    %472 = vector.extract_strided_slice %1 {offsets = [0, 35], sizes = [16, 1], strides = [1, 1]} : vector<16x42xf32> to vector<16x1xf32>
    %473 = vector.extract_strided_slice %454 {offsets = [3, 0], sizes = [1, 256], strides = [1, 1]} : vector<8x256xf32> to vector<1x256xf32>
    %474 = vector.broadcast %472 : vector<16x1xf32> to vector<16x256xf32>
    %475 = vector.broadcast %473 : vector<1x256xf32> to vector<16x256xf32>
    %476 = arith.mulf %474, %475 : vector<16x256xf32>
    %477 = arith.addf %471, %476 : vector<16x256xf32>
    %478 = vector.extract_strided_slice %1 {offsets = [0, 36], sizes = [16, 1], strides = [1, 1]} : vector<16x42xf32> to vector<16x1xf32>
    %479 = vector.extract_strided_slice %454 {offsets = [4, 0], sizes = [1, 256], strides = [1, 1]} : vector<8x256xf32> to vector<1x256xf32>
    %480 = vector.broadcast %478 : vector<16x1xf32> to vector<16x256xf32>
    %481 = vector.broadcast %479 : vector<1x256xf32> to vector<16x256xf32>
    %482 = arith.mulf %480, %481 : vector<16x256xf32>
    %483 = arith.addf %477, %482 : vector<16x256xf32>
    %484 = vector.extract_strided_slice %1 {offsets = [0, 37], sizes = [16, 1], strides = [1, 1]} : vector<16x42xf32> to vector<16x1xf32>
    %485 = vector.extract_strided_slice %454 {offsets = [5, 0], sizes = [1, 256], strides = [1, 1]} : vector<8x256xf32> to vector<1x256xf32>
    %486 = vector.broadcast %484 : vector<16x1xf32> to vector<16x256xf32>
    %487 = vector.broadcast %485 : vector<1x256xf32> to vector<16x256xf32>
    %488 = arith.mulf %486, %487 : vector<16x256xf32>
    %489 = arith.addf %483, %488 : vector<16x256xf32>
    %490 = vector.extract_strided_slice %1 {offsets = [0, 38], sizes = [16, 1], strides = [1, 1]} : vector<16x42xf32> to vector<16x1xf32>
    %491 = vector.extract_strided_slice %454 {offsets = [6, 0], sizes = [1, 256], strides = [1, 1]} : vector<8x256xf32> to vector<1x256xf32>
    %492 = vector.broadcast %490 : vector<16x1xf32> to vector<16x256xf32>
    %493 = vector.broadcast %491 : vector<1x256xf32> to vector<16x256xf32>
    %494 = arith.mulf %492, %493 : vector<16x256xf32>
    %495 = arith.addf %489, %494 : vector<16x256xf32>
    %496 = vector.extract_strided_slice %1 {offsets = [0, 39], sizes = [16, 1], strides = [1, 1]} : vector<16x42xf32> to vector<16x1xf32>
    %497 = vector.extract_strided_slice %454 {offsets = [7, 0], sizes = [1, 256], strides = [1, 1]} : vector<8x256xf32> to vector<1x256xf32>
    %498 = vector.broadcast %496 : vector<16x1xf32> to vector<16x256xf32>
    %499 = vector.broadcast %497 : vector<1x256xf32> to vector<16x256xf32>
    %500 = arith.mulf %498, %499 : vector<16x256xf32>
    %501 = arith.addf %495, %500 : vector<16x256xf32>
    %cst_107 = arith.constant 0.000000e+00 : f32
    %502 = vector.broadcast %cst_107 : f32 to vector<16x256xf32>
    %503 = arith.maximumf %501, %502 : vector<16x256xf32>
    %c0_108 = arith.constant 0 : index
    %c0_109 = arith.constant 0 : index
    %504 = vector.load %arg4[%c0_108, %c0_109] : memref<16x256xf32, #tpu.memory_space<vmem>>, vector<16x256xf32>
    tpu.vector_store %arg4[%c0_108, %c0_109], %503 {strides = array<i32>} : memref<16x256xf32, #tpu.memory_space<vmem>>, vector<16x256xf32>,
    return
  }
  func.func @transform_0(%arg0: i32) -> (i32, i32) {
    %c0_i32 = arith.constant 0 : i32
    %c0_i32_0 = arith.constant 0 : i32
    %c0_i32_1 = arith.constant 0 : i32
    return %c0_i32, %c0_i32_0 : i32, i32
  }
  func.func @transform_1(%arg0: i32) -> (i32, i32, i32) {
    %c0_i32 = arith.constant 0 : i32
    %c0_i32_0 = arith.constant 0 : i32
    %c0_i32_1 = arith.constant 0 : i32
    %c0_i32_2 = arith.constant 0 : i32
    return %c0_i32, %c0_i32_0, %c0_i32_1 : i32, i32, i32
  }
  func.func @transform_2(%arg0: i32) -> (i32, i32) {
    %c0_i32 = arith.constant 0 : i32
    %c0_i32_0 = arith.constant 0 : i32
    %c0_i32_1 = arith.constant 0 : i32
    return %c0_i32, %c0_i32_0 : i32, i32
  }
  func.func @transform_3(%arg0: i32) -> (i32, i32) {
    %c0_i32 = arith.constant 0 : i32
    %c0_i32_0 = arith.constant 0 : i32
    %c0_i32_1 = arith.constant 0 : i32
    return %c0_i32, %c0_i32_0 : i32, i32
  }
}

</mosaic_0001>

<bundles_post_ra>
// kernel: feature_ext_pallas.1
= control target key start
LH: loop header
LB: loop body
LE: loop exit
PB: predicated region body
PF: predicated region fallthrough
CT: control target
= control target key end

     0   :  { %v1127_v0 = vmov 0   ;;  %v1128_v1 = vmov 2   ;;  %v1129_v3 = vmov 4   ;;  %v1130_v4 = vmov 1   ;;  %s1135_s18 = smov 16   ;;  %s1136_s19 = smov 17   ;;  %s1626_s2 = inlined_call_operand.vmem [shape: f32[16,42], index: 2, kind: input, shape index: {}]   ;;  %s1627_s0 = inlined_call_operand.vmem [shape: f32[8,256], index: 0, kind: input, shape index: {}]   ;;  %s1628_s1 = inlined_call_operand.vmem [shape: f32[18,8,256], index: 1, kind: input, shape index: {}]   ;;  %s1629_s3 = inlined_call_operand.vmem [shape: f32[16,256], index: 3, kind: output, shape index: {}]  }
   0x1   :  { %1041 = vset.pattern.permute.xlu0 %v1127_v0  ;;  %1043 = vset.pattern.permute.xlu1 %v1128_v1  ;;  %v1200_v2 = vld [vmem:[%s1626_s2] sm:$0xff]  ;;  %v1131_v5 = vmov 3   ;;  %v1132_v6 = vmov 5   ;;  %v1133_v7 = vmov 6   ;;  %v1134_v8 = vmov 7   ;;  %v15_v13 = vld [vmem:[%s1627_s0 + $0x8] sm:$0xff] }
   0x2   :  { %20 = vperm.xlu0 %1041, %v1200_v2   ;;  %38 = vperm.xlu1 %1043, %v1200_v2   ;;  %v14_v12 = vld [vmem:[%s1627_s0] sm:$0xff]  ;;  %v24_v15 = vperm.slane %v15_v13, 0  ;;  %v32_v17 = vperm.slane %v15_v13, 1  ;;  %v42_v20 = vperm.slane %v15_v13, 2  ;;  %v52_v24 = vperm.slane %v15_v13, 3  ;;  %s1137_s20 = smov 15  }
   0x3   :  { %1045 = vset.pattern.permute.xlu2 %v1129_v3  ;;  %v23_v14 = vperm.slane %v14_v12, 0  ;;  %v31_v16 = vperm.slane %v14_v12, 1  ;;  %v41_v19 = vperm.slane %v14_v12, 2  ;;  %v51_v23 = vperm.slane %v14_v12, 3  ;;  %s1139_s21 = smov 127   ;;  %s1140_s22 = smov 1  }
   0x4   :  { %58 = vperm.xlu2 %1045, %v1200_v2   ;;  %v61_v29 = vperm.slane %v14_v12, 4  ;;  %v62_v30 = vperm.slane %v15_v13, 4  ;;  %v71_v35 = vperm.slane %v14_v12, 5  ;;  %v72_v36 = vperm.slane %v15_v13, 5  ;;  %s1141_s23 = smov 113   ;;  %s1144_s24 = smov 111  }
   0x5   :  { %v81_v43 = vperm.slane %v14_v12, 6  ;;  %v82_v44 = vperm.slane %v15_v13, 6  ;;  %v91_v47 = vperm.slane %v14_v12, 7  ;;  %v92_v48 = vperm.slane %v15_v13, 7  ;;  %s1145_s25 = smov 112  }
   0xa   :  { %1042 = vset.pattern.permute.xlu0 %v1130_v4  ;;  %1044 = vset.pattern.permute.xlu1 %v1131_v5 }
   0xb   :  { %28 = vperm.xlu0 %1042, %v1200_v2   ;;  %48 = vperm.xlu1 %1044, %v1200_v2  }
   0xc   :  { %1046 = vset.pattern.permute.xlu2 %v1132_v6 }
   0xd   :  { %68 = vperm.xlu2 %1046, %v1200_v2  }
  0x13   :  { %1047 = vset.pattern.permute.xlu1 %v1133_v7 }
  0x14   :  { %78 = vperm.xlu1 %1047, %v1200_v2  }
  0x15   :  { %1048 = vset.pattern.permute.xlu2 %v1134_v8 }
  0x16   :  { %88 = vperm.xlu2 %1048, %v1200_v2  }
  0x5e   :  { %v59_v9 = vpop.permute.xlu2 %58 }
  0x5f   :  { %v63_v41 = vmul.f32 %v61_v29, %v59_v9  ;;  %v64_v42 = vmul.f32 %v62_v30, %v59_v9 }
  0x67   :  { %v69_v18 = vpop.permute.xlu2 %68 }
  0x68   :  { %v73_v52 = vmul.f32 %v71_v35, %v69_v18  ;;  %v74_v53 = vmul.f32 %v72_v36, %v69_v18 }
  0x70   :  { %v89_v49 = vpop.permute.xlu2 %88 }
  0x71   :  { %v93_v59 = vmul.f32 %v91_v47, %v89_v49  ;;  %v94_v60 = vmul.f32 %v92_v48, %v89_v49 }
  0x74   :  { %v21_v10 = vpop.permute.xlu0 %20  ;;  %v39_v11 = vpop.permute.xlu1 %38 }
  0x75   :  { %v25_v25 = vmul.f32 %v23_v14, %v21_v10  ;;  %v26_v26 = vmul.f32 %v24_v15, %v21_v10  ;;  %v43_v31 = vmul.f32 %v41_v19, %v39_v11  ;;  %v44_v32 = vmul.f32 %v42_v20, %v39_v11 }
  0x7d   :  { %v29_v21 = vpop.permute.xlu0 %28  ;;  %v49_v22 = vpop.permute.xlu1 %48 }
  0x7e   :  { %v33_v27 = vmul.f32 %v31_v16, %v29_v21  ;;  %v34_v28 = vmul.f32 %v32_v17, %v29_v21  ;;  %v53_v39 = vmul.f32 %v51_v23, %v49_v22  ;;  %v54_v40 = vmul.f32 %v52_v24, %v49_v22 }
  0x80   :  { %v35_v33 = vadd.f32 %v33_v27, %v25_v25  ;;  %v36_v34 = vadd.f32 %v34_v28, %v26_v26 }
  0x82   :  { %v45_v37 = vadd.f32 %v43_v31, %v35_v33  ;;  %v46_v38 = vadd.f32 %v44_v32, %v36_v34 }
  0x84   :  { %v55_v45 = vadd.f32 %v53_v39, %v45_v37  ;;  %v56_v46 = vadd.f32 %v54_v40, %v46_v38 }
  0x86   :  { %v65_v50 = vadd.f32 %v63_v41, %v55_v45  ;;  %v66_v51 = vadd.f32 %v64_v42, %v56_v46  ;;  %v79_v54 = vpop.permute.xlu1 %78 }
  0x87   :  { %v83_v55 = vmul.f32 %v81_v43, %v79_v54  ;;  %v84_v56 = vmul.f32 %v82_v44, %v79_v54 }
  0x88   :  { %v75_v57 = vadd.f32 %v73_v52, %v65_v50  ;;  %v76_v58 = vadd.f32 %v74_v53, %v66_v51 }
  0x8a   :  { %v85_v61 = vadd.f32 %v83_v55, %v75_v57  ;;  %v86_v62 = vadd.f32 %v84_v56, %v76_v58  ;;  %v1138_v58 = vmov 40  }
  0x8b   :  { %1049 = vset.pattern.permute.xlu1 %v1138_v58 }
  0x8c   :  { %v95_v63 = vadd.f32 %v93_v59, %v85_v61  ;;  %v96_v0 = vadd.f32 %v94_v60, %v86_v62  ;;  %v1142_v59 = vmov 8   ;;  %v1143_v60 = vmov 9  }
  0x8d   :  { %1050 = vset.pattern.permute.xlu2 %v1142_v59  ;;  %1051 = vset.pattern.permute.xlu0 %v1143_v60  ;;  %v1146_v61 = vmov 10   ;;  %v1147_v62 = vmov 12  }
  0x8e   :  { %v99_v1 = vmul.f32 0.70710677, %v95_v63  ;;  %v100_v3 = vmul.f32 0.70710677, %v96_v0  ;;  %v97_v51 = vmul.f32 0.5, %v95_v63  ;;  %v98_v54 = vmul.f32 0.5, %v96_v0 }
  0x8f   :  { %v1148_v63 = vmov 11   ;;  %v1149_v0 = vmov 15  }
  0x90   :  { %v101_v4 = vand.u32 2147483647, %v99_v1  ;;  %v102_v5 = vand.u32 2147483647, %v100_v3  ;;  %vm145_vm0 = vcmp.ge.f32.partialorder %v99_v1, 0.0  ;;  %vm146_vm1 = vcmp.ge.f32.partialorder %v100_v3, 0.0 }
  0x91   :  { %v1150_v1 = vmov 14   ;;  %v1151_v3 = vmov 13  }
  0x92   :  { %v103_v6 = vmul.f32 0.3275911, %v101_v4  ;;  %v104_v7 = vmul.f32 0.3275911, %v102_v5  ;;  %v133_v18 = vsub.f32 0.0, %v101_v4  ;;  %v134_v20 = vsub.f32 0.0, %v102_v5 }
  0x94   :  { %v105_v8 = vadd.f32 1.0, %v103_v6  ;;  %v106_v9 = vadd.f32 1.0, %v104_v7  ;;  %v135_v24 = vmul.f32 %v133_v18, %v101_v4  ;;  %v136_v26 = vmul.f32 %v134_v20, %v102_v5 }
  0x95   :  { %v1152_v4 = vmov 17   ;;  %v1153_v5 = vmov 16   ;;  %v1154_v6 = vmov 20   ;;  %v1155_v7 = vmov 19  }
  0x96   :  { %1092 = vrcp.f32 %v105_v8  ;;  %v137_v30 = vmul.f32 1.442695, %v135_v24  ;;  %v139_v32 = vmul.f32 1.442695, %v136_v26  ;;  %v165_v26 = vld [vmem:[%s1628_s1 + $0x8] sm:$0xff] }
  0x97   :  { %1094 = vrcp.f32 %v106_v9 }
  0x98   :  { %1096 = vpow2.f32 %v137_v30 }
  0x99   :  { %1098 = vpow2.f32 %v139_v32 }
  0x9c   :  { %v1093_v10 = vpop.eup %1092 }
  0x9d   :  { %v1095_v11 = vpop.eup %1094  ;;  %v109_v12 = vmul.f32 %v1093_v10, %v105_v8  ;;  %v1156_v8 = vmov 18  }
  0x9e   :  { %v110_v13 = vmul.f32 %v1095_v11, %v106_v9  ;;  %v1097_v41 = vpop.eup %1096  ;;  %v1157_v9 = vmov 22  }
  0x9f   :  { %v111_v14 = vsub.f32 2.0, %v109_v12  ;;  %v1099_v43 = vpop.eup %1098 }
  0xa0   :  { %v112_v15 = vsub.f32 2.0, %v110_v13 }
  0xa1   :  { %v113_v16 = vmul.f32 %v1093_v10, %v111_v14  ;;  %v1158_v10 = vmov 21  }
  0xa2   :  { %v114_v17 = vmul.f32 %v1095_v11, %v112_v15  ;;  %v1159_v11 = vmov 23   ;;  %v159_v15 = vlaneseq }
  0xa3   :  { %v115_v19 = vmul.f32 1.0614054, %v113_v16 }
  0xa4   :  { %v116_v21 = vmul.f32 1.0614054, %v114_v17 }
  0xa5   :  { %v117_v22 = vadd.f32 -1.4531521, %v115_v19  ;;  %v1269_v19 = vand.u32 127, %v159_v15 }
  0xa6   :  { %v118_v23 = vadd.f32 -1.4531521, %v116_v21  ;;  %v957_v21 = vld [vmem:[%s1628_s1 + $0x10] sm:$0xff] }
  0xa7   :  { %v119_v25 = vmul.f32 %v117_v22, %v113_v16  ;;  %vm172_vm2 = vcmp.lt.s32.totalorder %v1269_v19, 16  ;;  %vm161_vm3 = vcmp.lt.s32.totalorder %v1269_v19, 17  ;;  %vm186_vm4 = vcmp.lt.s32.totalorder %v1269_v19, 15 }
  0xa8   :  { %v120_v27 = vmul.f32 %v118_v23, %v114_v17  ;;  %vm200_vm5 = vcmp.lt.s32.totalorder %v1269_v19, 1  ;;  %vm221_vm6 = vcmp.lt.s32.totalorder %v1269_v19, 127  ;;  %vm235_vm7 = vcmp.lt.s32.totalorder %v1269_v19, 113 }
  0xa9   :  { %v121_v28 = vadd.f32 1.4214138, %v119_v25  ;;  %v164_v25 = vld [vmem:[%s1628_s1] sm:$0xff]  ;;  %vm249_vm8 = vcmp.lt.s32.totalorder %v1269_v19, 112  ;;  %vm263_vm9 = vcmp.lt.s32.totalorder %v1269_v19, 111 }
  0xaa   :  { %v122_v29 = vadd.f32 1.4214138, %v120_v27 }
  0xab   :  { %v123_v31 = vmul.f32 %v121_v28, %v113_v16 }
  0xac   :  { %v124_v33 = vmul.f32 %v122_v29, %v114_v17 }
  0xad   :  { %v125_v34 = vadd.f32 -0.28449672, %v123_v31 }
  0xae   :  { %v126_v35 = vadd.f32 -0.28449672, %v124_v33 }
  0xaf   :  { %v127_v36 = vmul.f32 %v125_v34, %v113_v16  ;;  %v959_v34 = vld [vmem:[%s1628_s1 + $0x20] sm:$0xff] }
  0xb0   :  { %v128_v37 = vmul.f32 %v126_v35, %v114_v17  ;;  %v960_v35 = vld [vmem:[%s1628_s1 + $0x28] sm:$0xff] }
  0xb1   :  { %v129_v38 = vadd.f32 0.2548296, %v127_v36 }
  0xb2   :  { %v130_v39 = vadd.f32 0.2548296, %v128_v37 }
  0xb3   :  { %v131_v40 = vmul.f32 %v129_v38, %v113_v16  ;;  %v961_v38 = vld [vmem:[%s1628_s1 + $0x30] sm:$0xff] }
  0xb4   :  { %v132_v42 = vmul.f32 %v130_v39, %v114_v17  ;;  %v962_v39 = vld [vmem:[%s1628_s1 + $0x38] sm:$0xff] }
  0xb5   :  { %v141_v44 = vmul.f32 %v1097_v41, %v131_v40 }
  0xb6   :  { %v142_v45 = vmul.f32 %v1099_v43, %v132_v42 }
  0xb7   :  { %v143_v46 = vsub.f32 1.0, %v141_v44 }
  0xb8   :  { %v144_v47 = vsub.f32 1.0, %v142_v45 }
  0xb9   :  { %v147_v48 = vsub.f32 0.0, %v143_v46 }
  0xba   :  { %v148_v49 = vsub.f32 0.0, %v144_v47 }
  0xbb   :  { %v149_v50 = vsel %vm145_vm0, %v143_v46, %v147_v48 }
  0xbc   :  { %v150_v52 = vsel %vm146_vm1, %v144_v47, %v148_v49  ;;  %v151_v53 = vadd.f32 1.0, %v149_v50 }
  0xbd   :  { %v152_v55 = vadd.f32 1.0, %v150_v52  ;;  %v963_v52 = vld [vmem:[%s1628_s1 + $0x40] sm:$0xff] }
  0xbe   :  { %v1216_v56 = vmul.f32 %v151_v53, %v97_v51  ;;  %v964_v53 = vld [vmem:[%s1628_s1 + $0x48] sm:$0xff] }
  0xbf   :  { %v1218_v57 = vmul.f32 %v152_v55, %v98_v54  ;;  %v965_v54 = vld [vmem:[%s1628_s1 + $0x50] sm:$0xff]  ;;  %v966_v55 = vld [vmem:[%s1628_s1 + $0x58] sm:$0xff] }
  0xc0   :  { %168 = vrot.lane.b32.xlu2 %v1216_v56, %s1135_s18  ;;  %155 = vrot.lane.b32.xlu0 %v1216_v56, %s1136_s19 }
  0xc1   :  { %157 = vrot.lane.b32.xlu1 %v1218_v57, %s1136_s19 }
  0xc8   :  { %184 = vrot.lane.b32.xlu2 %v1218_v57, %s1137_s20  ;;  %170 = vrot.lane.b32.xlu0 %v1218_v57, %s1135_s18 }
  0xc9   :  { %182 = vrot.lane.b32.xlu1 %v1216_v56, %s1137_s20 }
  0xd0   :  { %217 = vrot.lane.b32.xlu2 %v1216_v56, %s1139_s21  ;;  %196 = vrot.lane.b32.xlu0 %v1216_v56, %s1140_s22 }
  0xd1   :  { %198 = vrot.lane.b32.xlu1 %v1218_v57, %s1140_s22 }
  0xd8   :  { %233 = vrot.lane.b32.xlu2 %v1218_v57, %s1141_s23  ;;  %219 = vrot.lane.b32.xlu0 %v1218_v57, %s1139_s21 }
  0xd9   :  { %231 = vrot.lane.b32.xlu1 %v1216_v56, %s1141_s23 }
  0xe0   :  { %259 = vrot.lane.b32.xlu2 %v1216_v56, %s1144_s24  ;;  %245 = vrot.lane.b32.xlu0 %v1216_v56, %s1145_s25 }
  0xe1   :  { %247 = vrot.lane.b32.xlu1 %v1218_v57, %s1145_s25 }
  0xe8   :  { %261 = vrot.lane.b32.xlu0 %v1218_v57, %s1144_s24  ;;  %338 = vperm.xlu2 %1050, %v1200_v2  }
  0xe9   :  { %274 = vperm.xlu1 %1049, %v1200_v2  }
  0xf0   :  { %346 = vperm.xlu0 %1051, %v1200_v2   ;;  %1053 = vset.pattern.permute.xlu2 %v1148_v63  ;;  %v214_v63 = vmul.f32 %v964_v53, %v1218_v57  ;;  %v968_v57 = vld [vmem:[%s1628_s1 + $0x68] sm:$0xff] }
  0xf1   :  { %1052 = vset.pattern.permute.xlu1 %v1146_v61  ;;  %366 = vperm.xlu2 %1053, %v1200_v2  }
  0xf2   :  { %356 = vperm.xlu1 %1052, %v1200_v2  }
  0xf8   :  { %1056 = vset.pattern.permute.xlu0 %v1150_v1 }
  0xf9   :  { %396 = vperm.xlu0 %1056, %v1200_v2   ;;  %1055 = vset.pattern.permute.xlu2 %v1151_v3 }
  0xfa   :  { %1054 = vset.pattern.permute.xlu1 %v1147_v62  ;;  %386 = vperm.xlu2 %1055, %v1200_v2  }
  0xfb   :  { %376 = vperm.xlu1 %1054, %v1200_v2  }
 0x101   :  { %1061 = vset.pattern.permute.xlu0 %v1155_v7 }
 0x102   :  { %1058 = vset.pattern.permute.xlu2 %v1153_v5  ;;  %444 = vperm.xlu0 %1061, %v1200_v2  }
 0x103   :  { %1057 = vset.pattern.permute.xlu1 %v1149_v0  ;;  %416 = vperm.xlu2 %1058, %v1200_v2   ;;  %v213_v0 = vmul.f32 %v963_v52, %v1216_v56 }
 0x104   :  { %406 = vperm.xlu1 %1057, %v1200_v2  }
 0x10b   :  { %1060 = vset.pattern.permute.xlu2 %v1156_v8 }
 0x10c   :  { %1059 = vset.pattern.permute.xlu1 %v1152_v4  ;;  %434 = vperm.xlu2 %1060, %v1200_v2  }
 0x10d   :  { %424 = vperm.xlu1 %1059, %v1200_v2  }
 0x114   :  { %1063 = vset.pattern.permute.xlu2 %v1158_v10  ;;  %v969_v10 = vld [vmem:[%s1628_s1 + $0x70] sm:$0xff] }
 0x115   :  { %1062 = vset.pattern.permute.xlu1 %v1154_v6  ;;  %464 = vperm.xlu2 %1063, %v1200_v2   ;;  %v967_v6 = vld [vmem:[%s1628_s1 + $0x60] sm:$0xff] }
 0x116   :  { %454 = vperm.xlu1 %1062, %v1200_v2  }
 0x11a   :  { %v169_v12 = vpop.permute.xlu2 %168 }
 0x11d   :  { %1065 = vset.pattern.permute.xlu2 %v1159_v11  ;;  %v970_v11 = vld [vmem:[%s1628_s1 + $0x78] sm:$0xff] }
 0x11e   :  { %1064 = vset.pattern.permute.xlu1 %v1157_v9  ;;  %484 = vperm.xlu2 %1065, %v1200_v2  }
 0x11f   :  { %474 = vperm.xlu1 %1064, %v1200_v2   ;;  %v958_v2 = vld [vmem:[%s1628_s1 + $0x18] sm:$0xff] }
 0x122   :  { %v185_v18 = vpop.permute.xlu2 %184 }
 0x12a   :  { %v218_v29 = vpop.permute.xlu2 %217 }
 0x132   :  { %v156_v13 = vpop.permute.xlu0 %155  ;;  %v234_v60 = vpop.permute.xlu2 %233 }
 0x133   :  { %v158_v14 = vpop.permute.xlu1 %157 }
 0x134   :  { %v162_v27 = vsel %vm161_vm3, %v156_v13, %v158_v14  ;;  %v163_v28 = vsel %vm161_vm3, %v158_v14, %v156_v13 }
 0x135   :  { %v166_v32 = vmul.f32 %v164_v25, %v163_v28  ;;  %v167_v33 = vmul.f32 %v165_v26, %v162_v27 }
 0x13a   :  { %v171_v16 = vpop.permute.xlu0 %170 }
 0x13b   :  { %v183_v17 = vpop.permute.xlu1 %182  ;;  %v173_v22 = vsel %vm172_vm2, %v169_v12, %v171_v16  ;;  %v174_v23 = vsel %vm172_vm2, %v171_v16, %v169_v12 }
 0x13c   :  { %v178_v30 = vmul.f32 %v957_v21, %v174_v23  ;;  %v179_v31 = vmul.f32 %v958_v2, %v173_v22  ;;  %v187_v36 = vsel %vm186_vm4, %v183_v17, %v185_v18  ;;  %v188_v37 = vsel %vm186_vm4, %v185_v18, %v183_v17  ;;  %v971_v21 = vld [vmem:[%s1628_s1 + $0x80] sm:$0xff]  ;;  %v972_v2 = vld [vmem:[%s1628_s1 + $0x88] sm:$0xff]  ;;  %v260_v22 = vpop.permute.xlu2 %259 }
 0x13d   :  { %v192_v46 = vmul.f32 %v959_v34, %v188_v37  ;;  %v193_v47 = vmul.f32 %v960_v35, %v187_v36 }
 0x13e   :  { %v180_v42 = vadd.f32 %v178_v30, %v166_v32  ;;  %v181_v43 = vadd.f32 %v179_v31, %v167_v33 }
 0x140   :  { %v194_v50 = vadd.f32 %v192_v46, %v180_v42  ;;  %v195_v51 = vadd.f32 %v193_v47, %v181_v43 }
 0x142   :  { %v197_v20 = vpop.permute.xlu0 %196 }
 0x143   :  { %v199_v24 = vpop.permute.xlu1 %198 }
 0x144   :  { %v201_v40 = vsel %vm200_vm5, %v197_v20, %v199_v24  ;;  %v202_v41 = vsel %vm200_vm5, %v199_v24, %v197_v20 }
 0x145   :  { %v206_v48 = vmul.f32 %v961_v38, %v202_v41  ;;  %v207_v49 = vmul.f32 %v962_v39, %v201_v40 }
 0x147   :  { %v208_v61 = vadd.f32 %v206_v48, %v194_v50  ;;  %v209_v62 = vadd.f32 %v207_v49, %v195_v51 }
 0x149   :  { %v216_v7 = vadd.f32 %v214_v63, %v209_v62  ;;  %v215_v8 = vadd.f32 %v213_v0, %v208_v61 }
 0x14a   :  { %v220_v44 = vpop.permute.xlu0 %219 }
 0x14b   :  { %v232_v45 = vpop.permute.xlu1 %231  ;;  %v222_v58 = vsel %vm221_vm6, %v218_v29, %v220_v44  ;;  %v223_v59 = vsel %vm221_vm6, %v220_v44, %v218_v29 }
 0x14c   :  { %v227_v1 = vmul.f32 %v965_v54, %v222_v58  ;;  %v228_v3 = vmul.f32 %v966_v55, %v223_v59  ;;  %v236_v56 = vsel %vm235_vm7, %v232_v45, %v234_v60  ;;  %v237_v9 = vsel %vm235_vm7, %v234_v60, %v232_v45 }
 0x14d   :  { %v241_v16 = vmul.f32 %v967_v6, %v236_v56  ;;  %v242_v17 = vmul.f32 %v968_v57, %v237_v9 }
 0x14e   :  { %v229_v14 = vadd.f32 %v227_v1, %v215_v8  ;;  %v230_v15 = vadd.f32 %v228_v3, %v216_v7  ;;  %v339_v3 = vpop.permute.xlu2 %338 }
 0x150   :  { %v244_v23 = vadd.f32 %v242_v17, %v230_v15  ;;  %v243_v24 = vadd.f32 %v241_v16, %v229_v14 }
 0x152   :  { %v246_v4 = vpop.permute.xlu0 %245 }
 0x153   :  { %v248_v5 = vpop.permute.xlu1 %247 }
 0x154   :  { %v250_v12 = vsel %vm249_vm8, %v246_v4, %v248_v5  ;;  %v251_v13 = vsel %vm249_vm8, %v248_v5, %v246_v4 }
 0x155   :  { %v255_v18 = vmul.f32 %v969_v10, %v250_v12  ;;  %v256_v20 = vmul.f32 %v970_v11, %v251_v13 }
 0x156   :  { %v367_v15 = vpop.permute.xlu2 %366 }
 0x157   :  { %v257_v28 = vadd.f32 %v255_v18, %v243_v24  ;;  %v258_v29 = vadd.f32 %v256_v20, %v244_v23 }
 0x15a   :  { %v262_v25 = vpop.permute.xlu0 %261 }
 0x15b   :  { %v264_v26 = vsel %vm263_vm9, %v260_v22, %v262_v25  ;;  %v265_v27 = vsel %vm263_vm9, %v262_v25, %v260_v22  ;;  %v275_v32 = vpop.permute.xlu1 %274 }
 0x15c   :  { %v269_v30 = vmul.f32 %v971_v21, %v264_v26  ;;  %v270_v31 = vmul.f32 %v972_v2, %v265_v27 }
 0x15e   :  { %v271_v33 = vadd.f32 %v269_v30, %v257_v28  ;;  %v272_v34 = vadd.f32 %v270_v31, %v258_v29 }
 0x160   :  { %v277_v35 = vadd.f32 %v275_v32, %v271_v33  ;;  %v1367_v36 = vadd.f32 %v275_v32, %v272_v34  ;;  %v387_v32 = vpop.permute.xlu2 %386 }
 0x162   :  { %v281_v37 = vmul.f32 0.70710677, %v277_v35  ;;  %v282_v38 = vmul.f32 0.70710677, %v1367_v36  ;;  %v279_v27 = vmul.f32 0.5, %v277_v35  ;;  %v280_v30 = vmul.f32 0.5, %v1367_v36 }
 0x164   :  { %v283_v39 = vand.u32 2147483647, %v281_v37  ;;  %v284_v40 = vand.u32 2147483647, %v282_v38  ;;  %v357_v12 = vpop.permute.xlu1 %356  ;;  %vm327_vm10 = vcmp.ge.f32.partialorder %v281_v37, 0.0  ;;  %vm328_vm11 = vcmp.ge.f32.partialorder %v282_v38, 0.0 }
 0x166   :  { %v285_v41 = vmul.f32 0.3275911, %v283_v39  ;;  %v286_v42 = vmul.f32 0.3275911, %v284_v40  ;;  %v315_v53 = vsub.f32 0.0, %v283_v39  ;;  %v316_v55 = vsub.f32 0.0, %v284_v40 }
 0x168   :  { %v287_v43 = vadd.f32 1.0, %v285_v41  ;;  %v288_v44 = vadd.f32 1.0, %v286_v42  ;;  %v317_v61 = vmul.f32 %v315_v53, %v283_v39  ;;  %v318_v63 = vmul.f32 %v316_v55, %v284_v40 }
 0x16a   :  { %1100 = vrcp.f32 %v287_v43  ;;  %v319_v5 = vmul.f32 1.442695, %v317_v61  ;;  %v321_v7 = vmul.f32 1.442695, %v318_v63 }
 0x16b   :  { %1102 = vrcp.f32 %v288_v44 }
 0x16c   :  { %1104 = vpow2.f32 %v319_v5 }
 0x16d   :  { %1106 = vpow2.f32 %v321_v7  ;;  %v377_v26 = vpop.permute.xlu1 %376 }
 0x170   :  { %v1101_v45 = vpop.eup %1100 }
 0x171   :  { %v1103_v46 = vpop.eup %1102  ;;  %v291_v47 = vmul.f32 %v1101_v45, %v287_v43  ;;  %v347_v43 = vpop.permute.xlu0 %346 }
 0x172   :  { %v292_v48 = vmul.f32 %v1103_v46, %v288_v44  ;;  %v1105_v16 = vpop.eup %1104 }
 0x173   :  { %v293_v49 = vsub.f32 2.0, %v291_v47  ;;  %v1107_v18 = vpop.eup %1106 }
 0x174   :  { %v294_v50 = vsub.f32 2.0, %v292_v48 }
 0x175   :  { %v295_v51 = vmul.f32 %v1101_v45, %v293_v49 }
 0x176   :  { %v296_v52 = vmul.f32 %v1103_v46, %v294_v50  ;;  %v407_v35 = vpop.permute.xlu1 %406 }
 0x177   :  { %v297_v54 = vmul.f32 1.0614054, %v295_v51 }
 0x178   :  { %v298_v58 = vmul.f32 1.0614054, %v296_v52 }
 0x179   :  { %v299_v59 = vadd.f32 -1.4531521, %v297_v54 }
 0x17a   :  { %v300_v60 = vadd.f32 -1.4531521, %v298_v58 }
 0x17b   :  { %v301_v62 = vmul.f32 %v299_v59, %v295_v51 }
 0x17c   :  { %v302_v0 = vmul.f32 %v300_v60, %v296_v52 }
 0x17d   :  { %v303_v1 = vadd.f32 1.4214138, %v301_v62 }
 0x17e   :  { %v304_v4 = vadd.f32 1.4214138, %v302_v0 }
 0x17f   :  { %v305_v6 = vmul.f32 %v303_v1, %v295_v51 }
 0x180   :  { %v306_v8 = vmul.f32 %v304_v4, %v296_v52 }
 0x181   :  { %v307_v57 = vadd.f32 -0.28449672, %v305_v6 }
 0x182   :  { %v308_v56 = vadd.f32 -0.28449672, %v306_v8 }
 0x183   :  { %v309_v9 = vmul.f32 %v307_v57, %v295_v51  ;;  %v397_v57 = vpop.permute.xlu0 %396 }
 0x184   :  { %v310_v10 = vmul.f32 %v308_v56, %v296_v52 }
 0x185   :  { %v311_v11 = vadd.f32 0.2548296, %v309_v9 }
 0x186   :  { %v312_v13 = vadd.f32 0.2548296, %v310_v10 }
 0x187   :  { %v313_v14 = vmul.f32 %v311_v11, %v295_v51  ;;  %v417_v51 = vpop.permute.xlu2 %416 }
 0x188   :  { %v314_v17 = vmul.f32 %v312_v13, %v296_v52 }
 0x189   :  { %v323_v20 = vmul.f32 %v1105_v16, %v313_v14 }
 0x18a   :  { %v324_v21 = vmul.f32 %v1107_v18, %v314_v17 }
 0x18b   :  { %v325_v2 = vsub.f32 1.0, %v323_v20 }
 0x18c   :  { %v326_v22 = vsub.f32 1.0, %v324_v21 }
 0x18d   :  { %v329_v23 = vsub.f32 0.0, %v325_v2 }
 0x18e   :  { %v330_v24 = vsub.f32 0.0, %v326_v22 }
 0x18f   :  { %v331_v25 = vsel %vm327_vm10, %v325_v2, %v329_v23  ;;  %v435_v17 = vpop.permute.xlu2 %434 }
 0x190   :  { %v332_v28 = vsel %vm328_vm11, %v326_v22, %v330_v24  ;;  %v333_v29 = vadd.f32 1.0, %v331_v25 }
 0x191   :  { %v334_v31 = vadd.f32 1.0, %v332_v28 }
 0x192   :  { %v335_v33 = vmul.f32 %v333_v29, %v279_v27 }
 0x193   :  { %v336_v34 = vmul.f32 %v334_v31, %v280_v30 }
 0x194   :  { %v341_v39 = vperm.slane %v335_v33, 0  ;;  %v359_v41 = vperm.slane %v335_v33, 2  ;;  %v349_v38 = vperm.slane %v335_v33, 1  ;;  %v369_v46 = vperm.slane %v335_v33, 3 }
 0x195   :  { %v342_v40 = vperm.slane %v336_v34, 0  ;;  %v360_v42 = vperm.slane %v336_v34, 2  ;;  %v350_v45 = vperm.slane %v336_v34, 1  ;;  %v370_v47 = vperm.slane %v336_v34, 3 }
 0x196   :  { %v343_v44 = vmul.f32 %v341_v39, %v339_v3  ;;  %v351_v48 = vmul.f32 %v349_v38, %v347_v43  ;;  %v379_v50 = vperm.slane %v335_v33, 4  ;;  %v380_v36 = vperm.slane %v336_v34, 4 }
 0x197   :  { %v344_v37 = vmul.f32 %v342_v40, %v339_v3  ;;  %v352_v49 = vmul.f32 %v350_v45, %v347_v43  ;;  %v361_v52 = vmul.f32 %v359_v41, %v357_v12  ;;  %v362_v53 = vmul.f32 %v360_v42, %v357_v12  ;;  %v425_v12 = vpop.permute.xlu1 %424  ;;  %v465_v41 = vpop.permute.xlu2 %464 }
 0x198   :  { %v353_v54 = vadd.f32 %v351_v48, %v343_v44  ;;  %v371_v58 = vmul.f32 %v369_v46, %v367_v15  ;;  %v372_v59 = vmul.f32 %v370_v47, %v367_v15  ;;  %v389_v60 = vperm.slane %v335_v33, 5  ;;  %v445_v45 = vpop.permute.xlu0 %444 }
 0x199   :  { %v354_v55 = vadd.f32 %v352_v49, %v344_v37  ;;  %v390_v61 = vperm.slane %v336_v34, 5  ;;  %v381_v0 = vmul.f32 %v379_v50, %v377_v26  ;;  %v382_v1 = vmul.f32 %v380_v36, %v377_v26 }
 0x19a   :  { %v363_v62 = vadd.f32 %v361_v52, %v353_v54  ;;  %v400_v5 = vperm.slane %v336_v34, 6  ;;  %v399_v6 = vperm.slane %v335_v33, 6  ;;  %v409_v7 = vperm.slane %v335_v33, 7 }
 0x19b   :  { %v364_v63 = vadd.f32 %v362_v53, %v354_v55  ;;  %v410_v8 = vperm.slane %v336_v34, 7  ;;  %v391_v56 = vmul.f32 %v389_v60, %v387_v32  ;;  %v392_v9 = vmul.f32 %v390_v61, %v387_v32 }
 0x19c   :  { %v373_v3 = vadd.f32 %v371_v58, %v363_v62  ;;  %v401_v15 = vmul.f32 %v399_v6, %v397_v57  ;;  %v402_v16 = vmul.f32 %v400_v5, %v397_v57  ;;  %v411_v18 = vmul.f32 %v409_v7, %v407_v35 }
 0x19d   :  { %v374_v4 = vadd.f32 %v372_v59, %v364_v63  ;;  %v412_v20 = vmul.f32 %v410_v8, %v407_v35 }
 0x19e   :  { %v383_v11 = vadd.f32 %v381_v0, %v373_v3 }
 0x19f   :  { %v384_v10 = vadd.f32 %v382_v1, %v374_v4  ;;  %v455_v34 = vpop.permute.xlu1 %454  ;;  %v485_v3 = vpop.permute.xlu2 %484 }
 0x1a0   :  { %v393_v14 = vadd.f32 %v391_v56, %v383_v11 }
 0x1a1   :  { %v394_v13 = vadd.f32 %v392_v9, %v384_v10 }
 0x1a2   :  { %v403_v21 = vadd.f32 %v401_v15, %v393_v14 }
 0x1a3   :  { %v404_v2 = vadd.f32 %v402_v16, %v394_v13 }
 0x1a4   :  { %v413_v22 = vadd.f32 %v411_v18, %v403_v21 }
 0x1a5   :  { %v414_v23 = vadd.f32 %v412_v20, %v404_v2 }
 0x1a6   :  { %v419_v24 = vperm.slane %v413_v22, 0  ;;  %v427_v26 = vperm.slane %v413_v22, 1  ;;  %v437_v28 = vperm.slane %v413_v22, 2  ;;  %v457_v44 = vperm.slane %v413_v22, 4 }
 0x1a7   :  { %v420_v25 = vperm.slane %v414_v23, 0  ;;  %v428_v27 = vperm.slane %v414_v23, 1  ;;  %v438_v29 = vperm.slane %v414_v23, 2  ;;  %v458_v37 = vperm.slane %v414_v23, 4  ;;  %v475_v59 = vpop.permute.xlu1 %474 }
 0x1a8   :  { %v421_v30 = vmul.f32 %v419_v24, %v417_v51  ;;  %v429_v32 = vmul.f32 %v427_v26, %v425_v12  ;;  %v439_v42 = vmul.f32 %v437_v28, %v435_v17  ;;  %v448_v47 = vperm.slane %v414_v23, 3 }
 0x1a9   :  { %v422_v31 = vmul.f32 %v420_v25, %v417_v51  ;;  %v430_v33 = vmul.f32 %v428_v27, %v425_v12  ;;  %v440_v43 = vmul.f32 %v438_v29, %v435_v17  ;;  %v447_v35 = vperm.slane %v413_v22, 3 }
 0x1aa   :  { %v431_v39 = vadd.f32 %v429_v32, %v421_v30  ;;  %v467_v48 = vperm.slane %v413_v22, 5  ;;  %v468_v49 = vperm.slane %v414_v23, 5  ;;  %v450_v36 = vmul.f32 %v448_v47, %v445_v45 }
 0x1ab   :  { %v432_v40 = vadd.f32 %v430_v33, %v422_v31  ;;  %v449_v50 = vmul.f32 %v447_v35, %v445_v45  ;;  %v459_v51 = vmul.f32 %v457_v44, %v455_v34  ;;  %v460_v52 = vmul.f32 %v458_v37, %v455_v34 }
 0x1ac   :  { %v441_v38 = vadd.f32 %v439_v42, %v431_v39  ;;  %v477_v53 = vperm.slane %v413_v22, 6  ;;  %v478_v54 = vperm.slane %v414_v23, 6  ;;  %v487_v60 = vperm.slane %v413_v22, 7 }
 0x1ad   :  { %v442_v46 = vadd.f32 %v440_v43, %v432_v40  ;;  %v488_v61 = vperm.slane %v414_v23, 7  ;;  %v469_v62 = vmul.f32 %v467_v48, %v465_v41  ;;  %v470_v63 = vmul.f32 %v468_v49, %v465_v41 }
 0x1ae   :  { %v451_v55 = vadd.f32 %v449_v50, %v441_v38  ;;  %v479_v4 = vmul.f32 %v477_v53, %v475_v59  ;;  %v480_v5 = vmul.f32 %v478_v54, %v475_v59  ;;  %v489_v8 = vmul.f32 %v487_v60, %v485_v3 }
 0x1af   :  { %v452_v58 = vadd.f32 %v450_v36, %v442_v46  ;;  %v490_v57 = vmul.f32 %v488_v61, %v485_v3 }
 0x1b0   :  { %v461_v0 = vadd.f32 %v459_v51, %v451_v55 }
 0x1b1   :  { %v462_v1 = vadd.f32 %v460_v52, %v452_v58 }
 0x1b2   :  { %v471_v6 = vadd.f32 %v469_v62, %v461_v0 }
 0x1b3   :  { %v472_v7 = vadd.f32 %v470_v63, %v462_v1 }
 0x1b4   :  { %v481_v56 = vadd.f32 %v479_v4, %v471_v6 }
 0x1b5   :  { %v482_v9 = vadd.f32 %v480_v5, %v472_v7  ;;  %v1160_v7 = vmov 41  }
 0x1b6   :  { %v491_v10 = vadd.f32 %v489_v8, %v481_v56  ;;  %1066 = vset.pattern.permute.xlu1 %v1160_v7  ;;  %v1161_v8 = vmov 24   ;;  %v1162_v56 = vmov 25   ;;  %v983_v7 = vld [vmem:[%s1628_s1 + $0xe0] sm:$0xff] }
 0x1b7   :  { %v492_v11 = vadd.f32 %v490_v57, %v482_v9  ;;  %1067 = vset.pattern.permute.xlu2 %v1161_v8  ;;  %v1410_v57 = vld [vmem:[%s1626_s2] sm:$0xff]  ;;  %1068 = vset.pattern.permute.xlu0 %v1162_v56  ;;  %v1163_v9 = vmov 27   ;;  %v984_v8 = vld [vmem:[%s1628_s1 + $0xe8] sm:$0xff] }
 0x1b8   :  { %v495_v12 = vmul.f32 0.70710677, %v491_v10  ;;  %v493_v63 = vmul.f32 0.5, %v491_v10  ;;  %v1164_v10 = vmov 26  }
 0x1b9   :  { %v496_v13 = vmul.f32 0.70710677, %v492_v11  ;;  %v494_v3 = vmul.f32 0.5, %v492_v11  ;;  %v1165_v11 = vmov 29  }
 0x1ba   :  { %v497_v14 = vand.u32 2147483647, %v495_v12  ;;  %vm541_vm12 = vcmp.ge.f32.partialorder %v495_v12, 0.0  ;;  %v1166_v12 = vmov 28  }
 0x1bb   :  { %v498_v15 = vand.u32 2147483647, %v496_v13  ;;  %vm542_vm13 = vcmp.ge.f32.partialorder %v496_v13, 0.0  ;;  %v1167_v13 = vmov 30  }
 0x1bc   :  { %v499_v16 = vmul.f32 0.3275911, %v497_v14  ;;  %v529_v28 = vsub.f32 0.0, %v497_v14 }
 0x1bd   :  { %v500_v17 = vmul.f32 0.3275911, %v498_v15  ;;  %v530_v30 = vsub.f32 0.0, %v498_v15 }
 0x1be   :  { %v501_v18 = vadd.f32 1.0, %v499_v16  ;;  %v531_v34 = vmul.f32 %v529_v28, %v497_v14  ;;  %v1168_v14 = vmov 32   ;;  %v17_v16 = vld [vmem:[%s1626_s2 + $0x8] sm:$0xff] }
 0x1bf   :  { %v502_v20 = vadd.f32 1.0, %v500_v17  ;;  %v532_v40 = vmul.f32 %v530_v30, %v498_v15  ;;  %v1169_v15 = vmov 31   ;;  %v1170_v17 = vmov 33  }
 0x1c0   :  { %1108 = vrcp.f32 %v501_v18  ;;  %v533_v44 = vmul.f32 1.442695, %v531_v34 }
 0x1c1   :  { %1110 = vrcp.f32 %v502_v20  ;;  %v535_v45 = vmul.f32 1.442695, %v532_v40 }
 0x1c2   :  { %1112 = vpow2.f32 %v533_v44 }
 0x1c3   :  { %1114 = vpow2.f32 %v535_v45 }
 0x1c6   :  { %v1109_v21 = vpop.eup %1108 }
 0x1c7   :  { %v1111_v2 = vpop.eup %1110  ;;  %v505_v22 = vmul.f32 %v1109_v21, %v501_v18  ;;  %v1171_v18 = vmov 36  }
 0x1c8   :  { %v506_v23 = vmul.f32 %v1111_v2, %v502_v20  ;;  %v1113_v51 = vpop.eup %1112  ;;  %v1172_v20 = vmov 34  }
 0x1c9   :  { %v507_v24 = vsub.f32 2.0, %v505_v22  ;;  %v1115_v53 = vpop.eup %1114  ;;  %v1175_v22 = vmov 39  }
 0x1ca   :  { %v508_v25 = vsub.f32 2.0, %v506_v23  ;;  %v1176_v23 = vmov 37  }
 0x1cb   :  { %v509_v26 = vmul.f32 %v1109_v21, %v507_v24  ;;  %v1173_v21 = vmov 38  }
 0x1cc   :  { %v510_v27 = vmul.f32 %v1111_v2, %v508_v25  ;;  %v1174_v2 = vmov 35  }
 0x1cd   :  { %v511_v29 = vmul.f32 1.0614054, %v509_v26 }
 0x1ce   :  { %v512_v31 = vmul.f32 1.0614054, %v510_v27 }
 0x1cf   :  { %v513_v32 = vadd.f32 -1.4531521, %v511_v29 }
 0x1d0   :  { %v514_v33 = vadd.f32 -1.4531521, %v512_v31  ;;  %v975_v31 = vld [vmem:[%s1628_s1 + $0xa0] sm:$0xff] }
 0x1d1   :  { %v515_v39 = vmul.f32 %v513_v32, %v509_v26  ;;  %v976_v32 = vld [vmem:[%s1628_s1 + $0xa8] sm:$0xff] }
 0x1d2   :  { %v516_v41 = vmul.f32 %v514_v33, %v510_v27 }
 0x1d3   :  { %v517_v42 = vadd.f32 1.4214138, %v515_v39 }
 0x1d4   :  { %v518_v43 = vadd.f32 1.4214138, %v516_v41  ;;  %v973_v41 = vld [vmem:[%s1628_s1 + $0x90] sm:$0xff] }
 0x1d5   :  { %v519_v37 = vmul.f32 %v517_v42, %v509_v26  ;;  %v974_v42 = vld [vmem:[%s1628_s1 + $0x98] sm:$0xff] }
 0x1d6   :  { %v520_v38 = vmul.f32 %v518_v43, %v510_v27 }
 0x1d7   :  { %v521_v46 = vadd.f32 -0.28449672, %v519_v37 }
 0x1d8   :  { %v522_v47 = vadd.f32 -0.28449672, %v520_v38 }
 0x1d9   :  { %v523_v35 = vmul.f32 %v521_v46, %v509_v26 }
 0x1da   :  { %v524_v48 = vmul.f32 %v522_v47, %v510_v27  ;;  %v977_v47 = vld [vmem:[%s1628_s1 + $0xb0] sm:$0xff] }
 0x1db   :  { %v525_v49 = vadd.f32 0.2548296, %v523_v35  ;;  %v978_v35 = vld [vmem:[%s1628_s1 + $0xb8] sm:$0xff] }
 0x1dc   :  { %v526_v50 = vadd.f32 0.2548296, %v524_v48 }
 0x1dd   :  { %v527_v36 = vmul.f32 %v525_v49, %v509_v26 }
 0x1de   :  { %v528_v52 = vmul.f32 %v526_v50, %v510_v27  ;;  %v979_v50 = vld [vmem:[%s1628_s1 + $0xc0] sm:$0xff] }
 0x1df   :  { %v537_v54 = vmul.f32 %v1113_v51, %v527_v36  ;;  %v980_v36 = vld [vmem:[%s1628_s1 + $0xc8] sm:$0xff] }
 0x1e0   :  { %v538_v55 = vmul.f32 %v1115_v53, %v528_v52 }
 0x1e1   :  { %v539_v58 = vsub.f32 1.0, %v537_v54 }
 0x1e2   :  { %v540_v59 = vsub.f32 1.0, %v538_v55 }
 0x1e3   :  { %v543_v60 = vsub.f32 0.0, %v539_v58 }
 0x1e4   :  { %v544_v61 = vsub.f32 0.0, %v540_v59 }
 0x1e5   :  { %v545_v62 = vsel %vm541_vm12, %v539_v58, %v543_v60 }
 0x1e6   :  { %v546_v0 = vsel %vm542_vm13, %v540_v59, %v544_v61  ;;  %v547_v1 = vadd.f32 1.0, %v545_v62 }
 0x1e7   :  { %v548_v4 = vadd.f32 1.0, %v546_v0 }
 0x1e8   :  { %v1371_v5 = vmul.f32 %v547_v1, %v493_v63  ;;  %v981_v1 = vld [vmem:[%s1628_s1 + $0xd0] sm:$0xff] }
 0x1e9   :  { %v1373_v6 = vmul.f32 %v548_v4, %v494_v3  ;;  %v982_v4 = vld [vmem:[%s1628_s1 + $0xd8] sm:$0xff] }
 0x1ea   :  { %562 = vrot.lane.b32.xlu2 %v1371_v5, %s1135_s18  ;;  %551 = vrot.lane.b32.xlu0 %v1371_v5, %s1136_s19 }
 0x1eb   :  { %553 = vrot.lane.b32.xlu1 %v1373_v6, %s1136_s19 }
 0x1f2   :  { %577 = vrot.lane.b32.xlu2 %v1373_v6, %s1137_s20  ;;  %564 = vrot.lane.b32.xlu0 %v1373_v6, %s1135_s18 }
 0x1f3   :  { %575 = vrot.lane.b32.xlu1 %v1371_v5, %s1137_s20 }
 0x1fa   :  { %608 = vrot.lane.b32.xlu2 %v1371_v5, %s1139_s21  ;;  %588 = vrot.lane.b32.xlu0 %v1371_v5, %s1140_s22 }
 0x1fb   :  { %590 = vrot.lane.b32.xlu1 %v1373_v6, %s1140_s22 }
 0x202   :  { %623 = vrot.lane.b32.xlu2 %v1373_v6, %s1141_s23  ;;  %610 = vrot.lane.b32.xlu0 %v1373_v6, %s1139_s21 }
 0x203   :  { %621 = vrot.lane.b32.xlu1 %v1371_v5, %s1141_s23 }
 0x20a   :  { %647 = vrot.lane.b32.xlu2 %v1371_v5, %s1144_s24  ;;  %634 = vrot.lane.b32.xlu0 %v1371_v5, %s1145_s25 }
 0x20b   :  { %636 = vrot.lane.b32.xlu1 %v1373_v6, %s1145_s25 }
 0x212   :  { %649 = vrot.lane.b32.xlu0 %v1373_v6, %s1144_s24  ;;  %725 = vperm.xlu2 %1067, %v1410_v57  }
 0x213   :  { %661 = vperm.xlu1 %1066, %v1410_v57  }
 0x21a   :  { %1070 = vset.pattern.permute.xlu2 %v1163_v9  ;;  %733 = vperm.xlu0 %1068, %v1410_v57  }
 0x21b   :  { %1069 = vset.pattern.permute.xlu1 %v1164_v10  ;;  %753 = vperm.xlu2 %1070, %v1410_v57  }
 0x21c   :  { %743 = vperm.xlu1 %1069, %v1410_v57  }
 0x222   :  { %1073 = vset.pattern.permute.xlu0 %v1167_v13 }
 0x223   :  { %1072 = vset.pattern.permute.xlu2 %v1165_v11  ;;  %783 = vperm.xlu0 %1073, %v1410_v57   ;;  %v605_v11 = vmul.f32 %v982_v4, %v1373_v6  ;;  %v987_v6 = vld [vmem:[%s1628_s1 + $0x100] sm:$0xff] }
 0x224   :  { %1071 = vset.pattern.permute.xlu1 %v1166_v12  ;;  %773 = vperm.xlu2 %1072, %v1410_v57   ;;  %v604_v12 = vmul.f32 %v981_v1, %v1371_v5 }
 0x225   :  { %763 = vperm.xlu1 %1071, %v1410_v57  }
 0x22b   :  { %1078 = vset.pattern.permute.xlu0 %v1170_v17 }
 0x22c   :  { %1075 = vset.pattern.permute.xlu2 %v1168_v14  ;;  %824 = vperm.xlu0 %1078, %v17_v16  }
 0x22d   :  { %1074 = vset.pattern.permute.xlu1 %v1169_v15  ;;  %805 = vperm.xlu2 %1075, %v1410_v57  }
 0x22e   :  { %793 = vperm.xlu1 %1074, %v1410_v57  }
 0x234   :  { %1083 = vset.pattern.permute.xlu0 %v1171_v18 }
 0x235   :  { %1077 = vset.pattern.permute.xlu2 %v1170_v17  ;;  %874 = vperm.xlu0 %1083, %v1410_v57   ;;  %v985_v17 = vld [vmem:[%s1628_s1 + $0xf0] sm:$0xff] }
 0x236   :  { %1076 = vset.pattern.permute.xlu1 %v1168_v14  ;;  %820 = vperm.xlu2 %1077, %v1410_v57  }
 0x237   :  { %810 = vperm.xlu1 %1076, %v17_v16  }
 0x23d   :  { %1088 = vset.pattern.permute.xlu0 %v1173_v21 }
 0x23e   :  { %1080 = vset.pattern.permute.xlu2 %v1172_v20  ;;  %914 = vperm.xlu0 %1088, %v17_v16  }
 0x23f   :  { %1079 = vset.pattern.permute.xlu1 %v1172_v20  ;;  %842 = vperm.xlu2 %1080, %v17_v16  }
 0x240   :  { %838 = vperm.xlu1 %1079, %v1410_v57  }
 0x244   :  { %v563_v24 = vpop.permute.xlu2 %562 }
 0x246   :  { %1091 = vset.pattern.permute.xlu0 %v1175_v22 }
 0x247   :  { %1082 = vset.pattern.permute.xlu2 %v1174_v2 }
 0x248   :  { %1081 = vset.pattern.permute.xlu1 %v1174_v2  ;;  %860 = vperm.xlu2 %1082, %v17_v16  }
 0x249   :  { %856 = vperm.xlu1 %1081, %v1410_v57  }
 0x24c   :  { %v578_v28 = vpop.permute.xlu2 %577 }
 0x250   :  { %1085 = vset.pattern.permute.xlu2 %v1176_v23 }
 0x251   :  { %1084 = vset.pattern.permute.xlu1 %v1171_v18  ;;  %892 = vperm.xlu2 %1085, %v1410_v57  }
 0x252   :  { %878 = vperm.xlu1 %1084, %v17_v16  }
 0x254   :  { %v609_v40 = vpop.permute.xlu2 %608 }
 0x259   :  { %1087 = vset.pattern.permute.xlu2 %v1173_v21  ;;  %v986_v21 = vld [vmem:[%s1628_s1 + $0xf8] sm:$0xff] }
 0x25a   :  { %1086 = vset.pattern.permute.xlu1 %v1176_v23  ;;  %910 = vperm.xlu2 %1087, %v1410_v57  }
 0x25b   :  { %896 = vperm.xlu1 %1086, %v17_v16  }
 0x25c   :  { %v552_v25 = vpop.permute.xlu0 %551  ;;  %v624_v3 = vpop.permute.xlu2 %623 }
 0x25d   :  { %v554_v26 = vpop.permute.xlu1 %553 }
 0x25e   :  { %v555_v43 = vsel %vm161_vm3, %v552_v25, %v554_v26  ;;  %v556_v44 = vsel %vm161_vm3, %v554_v26, %v552_v25 }
 0x25f   :  { %v560_v38 = vmul.f32 %v973_v41, %v556_v44  ;;  %v561_v46 = vmul.f32 %v974_v42, %v555_v43 }
 0x262   :  { %1090 = vset.pattern.permute.xlu2 %v1175_v22 }
 0x263   :  { %1089 = vset.pattern.permute.xlu1 %v1175_v22  ;;  %932 = vperm.xlu2 %1090, %v17_v16   ;;  %v988_v22 = vld [vmem:[%s1628_s1 + $0x108] sm:$0xff] }
 0x264   :  { %928 = vperm.xlu1 %1089, %v1410_v57   ;;  %v565_v27 = vpop.permute.xlu0 %564 }
 0x265   :  { %v576_v29 = vpop.permute.xlu1 %575  ;;  %v566_v33 = vsel %vm172_vm2, %v563_v24, %v565_v27  ;;  %v567_v34 = vsel %vm172_vm2, %v565_v27, %v563_v24 }
 0x266   :  { %v571_v37 = vmul.f32 %v975_v31, %v567_v34  ;;  %v572_v45 = vmul.f32 %v976_v32, %v566_v33  ;;  %v579_v48 = vsel %vm186_vm4, %v576_v29, %v578_v28  ;;  %v580_v49 = vsel %vm186_vm4, %v578_v28, %v576_v29  ;;  %v648_v31 = vpop.permute.xlu2 %647  ;;  %v989_v32 = vld [vmem:[%s1628_s1 + $0x110] sm:$0xff]  ;;  %v990_v33 = vld [vmem:[%s1628_s1 + $0x118] sm:$0xff] }
 0x267   :  { %v584_v59 = vmul.f32 %v977_v47, %v580_v49  ;;  %v585_v60 = vmul.f32 %v978_v35, %v579_v48 }
 0x268   :  { %v573_v53 = vadd.f32 %v571_v37, %v560_v38  ;;  %v574_v54 = vadd.f32 %v572_v45, %v561_v46 }
 0x26a   :  { %v586_v63 = vadd.f32 %v584_v59, %v573_v53  ;;  %v587_v0 = vadd.f32 %v585_v60, %v574_v54 }
 0x26c   :  { %v589_v30 = vpop.permute.xlu0 %588 }
 0x26d   :  { %v591_v39 = vpop.permute.xlu1 %590 }
 0x26e   :  { %v592_v51 = vsel %vm200_vm5, %v589_v30, %v591_v39  ;;  %v593_v52 = vsel %vm200_vm5, %v591_v39, %v589_v30  ;;  %v1524_v49 = vpop.permute.xlu2 %725 }
 0x26f   :  { %v597_v61 = vmul.f32 %v979_v50, %v593_v52  ;;  %v598_v62 = vmul.f32 %v980_v36, %v592_v51 }
 0x271   :  { %v599_v9 = vadd.f32 %v597_v61, %v586_v63  ;;  %v600_v10 = vadd.f32 %v598_v62, %v587_v0 }
 0x273   :  { %v607_v18 = vadd.f32 %v605_v11, %v600_v10  ;;  %v606_v20 = vadd.f32 %v604_v12, %v599_v9 }
 0x274   :  { %v611_v55 = vpop.permute.xlu0 %610 }
 0x275   :  { %v622_v58 = vpop.permute.xlu1 %621  ;;  %v612_v57 = vsel %vm221_vm6, %v609_v40, %v611_v55  ;;  %v613_v56 = vsel %vm221_vm6, %v611_v55, %v609_v40 }
 0x276   :  { %v617_v13 = vmul.f32 %v983_v7, %v612_v57  ;;  %v618_v14 = vmul.f32 %v984_v8, %v613_v56  ;;  %v625_v2 = vsel %vm235_vm7, %v622_v58, %v624_v3  ;;  %v626_v5 = vsel %vm235_vm7, %v624_v3, %v622_v58  ;;  %v1536_v59 = vpop.permute.xlu2 %753 }
 0x277   :  { %v630_v27 = vmul.f32 %v985_v17, %v625_v2  ;;  %v631_v28 = vmul.f32 %v986_v21, %v626_v5 }
 0x278   :  { %v619_v25 = vadd.f32 %v617_v13, %v606_v20  ;;  %v620_v26 = vadd.f32 %v618_v14, %v607_v18 }
 0x27a   :  { %v633_v34 = vadd.f32 %v631_v28, %v620_v26  ;;  %v632_v39 = vadd.f32 %v630_v27, %v619_v25 }
 0x27c   :  { %v635_v15 = vpop.permute.xlu0 %634 }
 0x27d   :  { %v637_v16 = vpop.permute.xlu1 %636 }
 0x27e   :  { %v638_v23 = vsel %vm249_vm8, %v635_v15, %v637_v16  ;;  %v639_v24 = vsel %vm249_vm8, %v637_v16, %v635_v15  ;;  %v1540_v7 = vpop.permute.xlu2 %773 }
 0x27f   :  { %v643_v29 = vmul.f32 %v987_v6, %v638_v23  ;;  %v644_v30 = vmul.f32 %v988_v22, %v639_v24 }
 0x281   :  { %v645_v43 = vadd.f32 %v643_v29, %v632_v39  ;;  %v646_v44 = vadd.f32 %v644_v30, %v633_v34 }
 0x284   :  { %v650_v40 = vpop.permute.xlu0 %649 }
 0x285   :  { %v651_v41 = vsel %vm263_vm9, %v648_v31, %v650_v40  ;;  %v652_v42 = vsel %vm263_vm9, %v650_v40, %v648_v31  ;;  %v662_v38 = vpop.permute.xlu1 %661 }
 0x286   :  { %v656_v37 = vmul.f32 %v989_v32, %v651_v41  ;;  %v657_v45 = vmul.f32 %v990_v33, %v652_v42 }
 0x287   :  { %v1544_v6 = vpop.permute.xlu2 %805 }
 0x288   :  { %v658_v46 = vadd.f32 %v656_v37, %v645_v43  ;;  %v659_v47 = vadd.f32 %v657_v45, %v646_v44 }
 0x28a   :  { %v1520_v35 = vadd.f32 %v662_v38, %v658_v46  ;;  %v1522_v48 = vadd.f32 %v662_v38, %v659_v47 }
 0x28c   :  { %v1527_v50 = vmul.f32 0.70710677, %v1520_v35  ;;  %v1530_v36 = vmul.f32 0.70710677, %v1522_v48  ;;  %v666_v45 = vmul.f32 0.5, %v1520_v35  ;;  %v667_v47 = vmul.f32 0.5, %v1522_v48 }
 0x28e   :  { %v670_v19 = vand.u32 2147483647, %v1527_v50  ;;  %v671_v51 = vand.u32 2147483647, %v1530_v36  ;;  %v1534_v58 = vpop.permute.xlu1 %743  ;;  %vm714_vm14 = vcmp.ge.f32.partialorder %v1527_v50, 0.0  ;;  %vm715_vm15 = vcmp.ge.f32.partialorder %v1530_v36, 0.0 }
 0x290   :  { %v672_v52 = vmul.f32 0.3275911, %v670_v19  ;;  %v673_v53 = vmul.f32 0.3275911, %v671_v51  ;;  %v702_v57 = vsub.f32 0.0, %v670_v19  ;;  %v703_v9 = vsub.f32 0.0, %v671_v51  ;;  %v1548_v39 = vpop.permute.xlu2 %820 }
 0x292   :  { %v674_v54 = vadd.f32 1.0, %v672_v52  ;;  %v675_v55 = vadd.f32 1.0, %v673_v53  ;;  %v704_v13 = vmul.f32 %v702_v57, %v670_v19  ;;  %v705_v15 = vmul.f32 %v703_v9, %v671_v51  ;;  %v734_v51 = vpop.permute.xlu0 %733 }
 0x294   :  { %1116 = vrcp.f32 %v674_v54  ;;  %v706_v20 = vmul.f32 1.442695, %v704_v13  ;;  %v708_v5 = vmul.f32 1.442695, %v705_v15 }
 0x295   :  { %1118 = vrcp.f32 %v675_v55 }
 0x296   :  { %1120 = vpow2.f32 %v706_v20 }
 0x297   :  { %v1538_v3 = vpop.permute.xlu1 %763  ;;  %1122 = vpow2.f32 %v708_v5 }
 0x29a   :  { %v1117_v60 = vpop.eup %1116  ;;  %v784_v57 = vpop.permute.xlu0 %783 }
 0x29b   :  { %v1119_v61 = vpop.eup %1118  ;;  %v678_v62 = vmul.f32 %v1117_v60, %v674_v54 }
 0x29c   :  { %v679_v63 = vmul.f32 %v1119_v61, %v675_v55  ;;  %v1121_v30 = vpop.eup %1120  ;;  %v1556_v55 = vpop.permute.xlu2 %842 }
 0x29d   :  { %v680_v0 = vsub.f32 2.0, %v678_v62  ;;  %v1123_v33 = vpop.eup %1122 }
 0x29e   :  { %v681_v1 = vsub.f32 2.0, %v679_v63 }
 0x29f   :  { %v682_v4 = vmul.f32 %v1117_v60, %v680_v0 }
 0x2a0   :  { %v683_v8 = vmul.f32 %v1119_v61, %v681_v1  ;;  %v1542_v21 = vpop.permute.xlu1 %793 }
 0x2a1   :  { %v684_v56 = vmul.f32 1.0614054, %v682_v4 }
 0x2a2   :  { %v685_v10 = vmul.f32 1.0614054, %v683_v8 }
 0x2a3   :  { %v686_v11 = vadd.f32 -1.4531521, %v684_v56 }
 0x2a4   :  { %v687_v12 = vadd.f32 -1.4531521, %v685_v10  ;;  %v1562_v15 = vpop.permute.xlu2 %860 }
 0x2a5   :  { %v688_v14 = vmul.f32 %v686_v11, %v682_v4 }
 0x2a6   :  { %v689_v16 = vmul.f32 %v687_v12, %v683_v8 }
 0x2a7   :  { %v690_v17 = vadd.f32 1.4214138, %v688_v14 }
 0x2a8   :  { %v691_v18 = vadd.f32 1.4214138, %v689_v16 }
 0x2a9   :  { %v692_v2 = vmul.f32 %v690_v17, %v682_v4  ;;  %v1546_v32 = vpop.permute.xlu1 %810 }
 0x2aa   :  { %v693_v22 = vmul.f32 %v691_v18, %v683_v8 }
 0x2ab   :  { %v694_v23 = vadd.f32 -0.28449672, %v692_v2 }
 0x2ac   :  { %v695_v24 = vadd.f32 -0.28449672, %v693_v22 }
 0x2ad   :  { %v696_v25 = vmul.f32 %v694_v23, %v682_v4 }
 0x2ae   :  { %v697_v26 = vmul.f32 %v695_v24, %v683_v8 }
 0x2af   :  { %v698_v27 = vadd.f32 0.2548296, %v696_v25 }
 0x2b0   :  { %v699_v28 = vadd.f32 0.2548296, %v697_v26 }
 0x2b1   :  { %v700_v29 = vmul.f32 %v698_v27, %v682_v4 }
 0x2b2   :  { %v701_v31 = vmul.f32 %v699_v28, %v683_v8  ;;  %v1554_v53 = vpop.permute.xlu1 %838 }
 0x2b3   :  { %v710_v34 = vmul.f32 %v1121_v30, %v700_v29 }
 0x2b4   :  { %v711_v40 = vmul.f32 %v1123_v33, %v701_v31 }
 0x2b5   :  { %v712_v41 = vsub.f32 1.0, %v710_v34 }
 0x2b6   :  { %v713_v42 = vsub.f32 1.0, %v711_v40 }
 0x2b7   :  { %v716_v43 = vsub.f32 0.0, %v712_v41 }
 0x2b8   :  { %v717_v44 = vsub.f32 0.0, %v713_v42 }
 0x2b9   :  { %v718_v37 = vsel %vm714_vm14, %v712_v41, %v716_v43  ;;  %v825_v41 = vpop.permute.xlu0 %824 }
 0x2ba   :  { %v719_v38 = vsel %vm715_vm15, %v713_v42, %v717_v44  ;;  %v720_v46 = vadd.f32 1.0, %v718_v37 }
 0x2bb   :  { %v721_v19 = vadd.f32 1.0, %v719_v38  ;;  %v857_v10 = vpop.permute.xlu1 %856 }
 0x2bc   :  { %v722_v52 = vmul.f32 %v720_v46, %v666_v45  ;;  %v893_v45 = vpop.permute.xlu2 %892  ;;  %v1125_v46 = vld [vmem:[%s1627_s0] sm:$0xff] }
 0x2bd   :  { %v723_v54 = vmul.f32 %v721_v19, %v667_v47  ;;  %v1126_v19 = vld [vmem:[%s1627_s0 + $0x8] sm:$0xff] }
 0x2be   :  { %v728_v60 = vperm.slane %v722_v52, 0  ;;  %v746_v61 = vperm.slane %v722_v52, 2  ;;  %v736_v0 = vperm.slane %v722_v52, 1  ;;  %v756_v1 = vperm.slane %v722_v52, 3 }
 0x2bf   :  { %v729_v50 = vperm.slane %v723_v54, 0  ;;  %v747_v62 = vperm.slane %v723_v54, 2  ;;  %v737_v63 = vperm.slane %v723_v54, 1  ;;  %v757_v48 = vperm.slane %v723_v54, 3 }
 0x2c0   :  { %v730_v36 = vmul.f32 %v728_v60, %v1524_v49  ;;  %v738_v4 = vmul.f32 %v736_v0, %v734_v51  ;;  %v748_v56 = vmul.f32 %v746_v61, %v1534_v58  ;;  %v766_v11 = vperm.slane %v722_v52, 4 }
 0x2c1   :  { %v731_v35 = vmul.f32 %v729_v50, %v1524_v49  ;;  %v739_v8 = vmul.f32 %v737_v63, %v734_v51  ;;  %v749_v9 = vmul.f32 %v747_v62, %v1534_v58  ;;  %v767_v12 = vperm.slane %v723_v54, 4 }
 0x2c2   :  { %v740_v13 = vadd.f32 %v738_v4, %v730_v36  ;;  %v776_v16 = vperm.slane %v722_v52, 5  ;;  %v777_v49 = vperm.slane %v723_v54, 5  ;;  %v758_v17 = vmul.f32 %v756_v1, %v1536_v59 }
 0x2c3   :  { %v741_v14 = vadd.f32 %v739_v8, %v731_v35  ;;  %v759_v18 = vmul.f32 %v757_v48, %v1536_v59  ;;  %v787_v5 = vperm.slane %v723_v54, 6  ;;  %v786_v22 = vperm.slane %v722_v52, 6  ;;  %v875_v48 = vpop.permute.xlu0 %874 }
 0x2c4   :  { %v750_v20 = vadd.f32 %v748_v56, %v740_v13  ;;  %v768_v23 = vmul.f32 %v766_v11, %v1538_v3  ;;  %v769_v58 = vmul.f32 %v767_v12, %v1538_v3  ;;  %v778_v26 = vmul.f32 %v776_v16, %v1540_v7  ;;  %v1570_v42 = vpop.permute.xlu1 %878  ;;  %v911_v11 = vpop.permute.xlu2 %910 }
 0x2c5   :  { %v751_v2 = vadd.f32 %v749_v9, %v741_v14  ;;  %v779_v27 = vmul.f32 %v777_v49, %v1540_v7  ;;  %v796_v28 = vperm.slane %v722_v52, 7  ;;  %v797_v29 = vperm.slane %v723_v54, 7 }
 0x2c6   :  { %v760_v24 = vadd.f32 %v758_v17, %v750_v20  ;;  %v788_v34 = vmul.f32 %v786_v22, %v784_v57  ;;  %v789_v40 = vmul.f32 %v787_v5, %v784_v57 }
 0x2c7   :  { %v761_v25 = vadd.f32 %v759_v18, %v751_v2  ;;  %v798_v43 = vmul.f32 %v796_v28, %v1542_v21  ;;  %v799_v3 = vmul.f32 %v797_v29, %v1542_v21 }
 0x2c8   :  { %v770_v31 = vadd.f32 %v768_v23, %v760_v24 }
 0x2c9   :  { %v771_v30 = vadd.f32 %v769_v58, %v761_v25 }
 0x2ca   :  { %v780_v59 = vadd.f32 %v778_v26, %v770_v31 }
 0x2cb   :  { %v781_v33 = vadd.f32 %v779_v27, %v771_v30 }
 0x2cc   :  { %v790_v44 = vadd.f32 %v788_v34, %v780_v59 }
 0x2cd   :  { %v791_v37 = vadd.f32 %v789_v40, %v781_v33  ;;  %v897_v4 = vpop.permute.xlu1 %896 }
 0x2ce   :  { %v800_v38 = vadd.f32 %v798_v43, %v790_v44 }
 0x2cf   :  { %v801_v7 = vadd.f32 %v799_v3, %v791_v37 }
 0x2d0   :  { %v1577_v47 = vadd.f32 %v1125_v46, %v800_v38 }
 0x2d1   :  { %v1582_v51 = vadd.f32 %v1126_v19, %v801_v7 }
 0x2d2   :  { %v813_v52 = vperm.slane %v1577_v47, 0  ;;  %v827_v54 = vperm.slane %v1577_v47, 1  ;;  %v845_v50 = vperm.slane %v1577_v47, 2  ;;  %v863_v62 = vperm.slane %v1577_v47, 3 }
 0x2d3   :  { %v814_v21 = vperm.slane %v1582_v51, 0  ;;  %v828_v60 = vperm.slane %v1582_v51, 1  ;;  %v846_v61 = vperm.slane %v1582_v51, 2  ;;  %v864_v36 = vperm.slane %v1582_v51, 3 }
 0x2d4   :  { %v815_v35 = vmul.f32 %v813_v52, %v1544_v6  ;;  %v829_v0 = vmul.f32 %v827_v54, %v1548_v39  ;;  %v847_v56 = vmul.f32 %v845_v50, %v1554_v53  ;;  %v865_v12 = vmul.f32 %v863_v62, %v857_v10 }
 0x2d5   :  { %v816_v63 = vmul.f32 %v814_v21, %v1544_v6  ;;  %v830_v1 = vmul.f32 %v828_v60, %v1548_v39  ;;  %v848_v9 = vmul.f32 %v846_v61, %v1554_v53  ;;  %v866_v13 = vmul.f32 %v864_v36, %v857_v10 }
 0x2d6   :  { %v833_v8 = vadd.f32 %v829_v0, %v815_v35  ;;  %v867_v14 = vmul.f32 %v863_v62, %v1562_v15  ;;  %v818_v16 = vmul.f32 %v814_v21, %v1546_v32  ;;  %v817_v17 = vmul.f32 %v813_v52, %v1546_v32  ;;  %v929_v38 = vpop.permute.xlu1 %928 }
 0x2d7   :  { %v834_v57 = vadd.f32 %v830_v1, %v816_v63  ;;  %v831_v39 = vmul.f32 %v827_v54, %v825_v41  ;;  %v868_v18 = vmul.f32 %v864_v36, %v1562_v15  ;;  %v899_v20 = vperm.slane %v1577_v47, 5 }
 0x2d8   :  { %v851_v6 = vadd.f32 %v847_v56, %v833_v8  ;;  %v900_v2 = vperm.slane %v1582_v51, 5  ;;  %v832_v5 = vmul.f32 %v828_v60, %v825_v41  ;;  %v849_v10 = vmul.f32 %v845_v50, %v1556_v55 }
 0x2d9   :  { %v852_v49 = vadd.f32 %v848_v9, %v834_v57  ;;  %v835_v22 = vadd.f32 %v831_v39, %v817_v17  ;;  %v881_v23 = vperm.slane %v1577_v47, 4  ;;  %v850_v58 = vmul.f32 %v846_v61, %v1556_v55  ;;  %v915_v55 = vpop.permute.xlu0 %914 }
 0x2da   :  { %v869_v53 = vadd.f32 %v865_v12, %v851_v6  ;;  %v836_v24 = vadd.f32 %v832_v5, %v818_v16  ;;  %v882_v25 = vperm.slane %v1582_v51, 4  ;;  %v917_v32 = vperm.slane %v1577_v47, 6 }
 0x2db   :  { %v870_v26 = vadd.f32 %v866_v13, %v852_v49  ;;  %v853_v15 = vadd.f32 %v849_v10, %v835_v22  ;;  %v918_v27 = vperm.slane %v1582_v51, 6  ;;  %v883_v28 = vmul.f32 %v881_v23, %v875_v48 }
 0x2dc   :  { %v901_v29 = vmul.f32 %v899_v20, %v893_v45  ;;  %v902_v30 = vmul.f32 %v900_v2, %v893_v45  ;;  %v854_v31 = vadd.f32 %v850_v58, %v836_v24  ;;  %v885_v33 = vmul.f32 %v881_v23, %v1570_v42  ;;  %v933_v45 = vpop.permute.xlu2 %932 }
 0x2dd   :  { %v871_v59 = vadd.f32 %v867_v14, %v853_v15  ;;  %v884_v34 = vmul.f32 %v882_v25, %v875_v48  ;;  %v887_v40 = vadd.f32 %v883_v28, %v869_v53  ;;  %v903_v41 = vmul.f32 %v899_v20, %v897_v4 }
 0x2de   :  { %v872_v43 = vadd.f32 %v868_v18, %v854_v31  ;;  %v886_v3 = vmul.f32 %v882_v25, %v1570_v42  ;;  %v919_v44 = vmul.f32 %v917_v32, %v911_v11  ;;  %v935_v37 = vperm.slane %v1577_v47, 7 }
 0x2df   :  { %v889_v7 = vadd.f32 %v885_v33, %v871_v59  ;;  %v920_v46 = vmul.f32 %v918_v27, %v911_v11  ;;  %v888_v19 = vadd.f32 %v884_v34, %v870_v26  ;;  %v905_v52 = vadd.f32 %v901_v29, %v887_v40 }
 0x2e0   :  { %v890_v21 = vadd.f32 %v886_v3, %v872_v43  ;;  %v904_v54 = vmul.f32 %v900_v2, %v897_v4  ;;  %v936_v60 = vperm.slane %v1582_v51, 7  ;;  %v921_v50 = vmul.f32 %v917_v32, %v915_v55 }
 0x2e1   :  { %v906_v61 = vadd.f32 %v902_v30, %v888_v19  ;;  %v907_v62 = vadd.f32 %v903_v41, %v889_v7  ;;  %v923_v36 = vadd.f32 %v919_v44, %v905_v52  ;;  %v937_v35 = vmul.f32 %v935_v37, %v929_v38 }
 0x2e2   :  { %v908_v63 = vadd.f32 %v904_v54, %v890_v21  ;;  %v939_v42 = vmul.f32 %v935_v37, %v933_v45  ;;  %v922_v0 = vmul.f32 %v918_v27, %v915_v55  ;;  %v938_v48 = vmul.f32 %v936_v60, %v929_v38 }
 0x2e3   :  { %v925_v1 = vadd.f32 %v921_v50, %v907_v62  ;;  %v924_v47 = vadd.f32 %v920_v46, %v906_v61  ;;  %v941_v8 = vadd.f32 %v937_v35, %v923_v36  ;;  %v940_v57 = vmul.f32 %v936_v60, %v933_v45 }
 0x2e4   :  { %v926_v56 = vadd.f32 %v922_v0, %v908_v63 }
 0x2e5   :  { %v943_v9 = vadd.f32 %v939_v42, %v925_v1  ;;  %v942_v11 = vadd.f32 %v938_v48, %v924_v47  ;;  %v945_v12 = vmax.f32 %v941_v8, 0.0 }
 0x2e6   :  { %v944_v4 = vadd.f32 %v940_v57, %v926_v56 }
 0x2e7   :  { %v947_v13 = vmax.f32 %v943_v9, 0.0  ;;  %v946_v51 = vmax.f32 %v942_v11, 0.0  ;;  %949 = vst [vmem:[%s1629_s3] sm:$0xff] %v945_v12 }
 0x2e8   :  { %v948_v14 = vmax.f32 %v944_v4, 0.0 }
 0x2e9   :  { %951 = vst [vmem:[%s1629_s3 + $0x10] sm:$0xff] %v947_v13 }
 0x2ea   :  { %952 = vst [vmem:[%s1629_s3 + $0x18] sm:$0xff] %v948_v14 }
 0x2eb   :  { %950 = vst [vmem:[%s1629_s3 + $0x8] sm:$0xff] %v946_v51 }

</bundles_post_ra>
